<compile_context>
chip_gen: v7x
topology: tpu7x:2x2x1
jax: 0.10.0
libtpu: 0.0.40
codegen_flags: <defaults>
</compile_context>

<pallas_src>
import numpy as np
import jax
import jax.numpy as jnp
from jax.experimental import pallas as pl
from jax.experimental.pallas import tpu as pltpu

# --- module hyperparameters (from bpnn_LE.py) --------------------------------
NLAYERS = 3
NNEURONS = [32, 32, 32]
NFEAT = 16                    # nfeat (free parameter in the original script)
ALL_SPECIES = [1, 8]          # stand-in for np.unique(... atomic numbers ...)
TM = 512                      # atoms per tile (per grid step)


def _round_up(x, m):
    return ((x + m - 1) // m) * m


def _default_ncores():
    """1 TensorCore on v5e/v6e, 2 on v7x; the leading grid axis only pays for
    itself when it actually shards across cores."""
    try:
        kind = jax.devices()[0].device_kind.lower()
    except Exception:
        return 1
    return 2 if "v7" in kind else 1


# --- Pallas kernel ------------------------------------------------------------
def bpnn_fused_kernel(tile_species_ref,            # scalar prefetch (SMEM)
                      x_ref, idx_ref,
                      w1, b1, w2, b2, w3, b3, w4, b4,
                      out_ref):
    """One atom tile of whichever species this tile belongs to.

    x_ref   : (TM, NFEAT)        f32  atom features for this tile
    idx_ref : (TM, 1)            i32  target structure row (-1 for padding rows)
    w*/b*   : full stacked species weights, VMEM-resident (DMA'd once)
              w1 (S,NFEAT,32) b1 (S,1,32) w2/w3 (S,32,32) b2/b3 (S,1,32)
              w4 (S,1,32)  [pre-transposed]  b4 (S,1,1)
    out_ref : (8, n_struct_pad)  f32  lane-dense per-core accumulator
                                      (all 8 sublanes carry identical values)
    """
    @pl.when(pl.program_id(1) == 0)
    def _():
        out_ref[...] = jnp.zeros_like(out_ref)

    tile_idx = pl.program_id(0) * pl.num_programs(1) + pl.program_id(1)
    s = tile_species_ref[tile_idx]                                        # species id for this tile

    h = jnp.tanh(jnp.dot(x_ref[...], w1[s],
                         preferred_element_type=jnp.float32) + b1[s])
    h = jnp.tanh(jnp.dot(h, w2[s],
                         preferred_element_type=jnp.float32) + b2[s])
    h = jnp.tanh(jnp.dot(h, w3[s],
                         preferred_element_type=jnp.float32) + b3[s])     # (TM, 32)

    # Per-atom energy: y_i = sum_f h[i,f] * w4[f] + b4   (VPU mult + lane reduce)
    y = jnp.sum(h * w4[s], axis=-1, keepdims=True) + b4[s]                # (TM, 1)

    # Scatter-add fused into ONE K=TM MXU contraction against the one-hot of
    # structure ids. Padding rows (idx = -1) never match the iota -> zero cols.
    n_struct_pad = out_ref.shape[1]
    struct_ids = jax.lax.broadcasted_iota(jnp.int32, (1, n_struct_pad), 1)
    onehot = (idx_ref[...] == struct_ids).astype(jnp.float32)             # (TM, n_struct_pad)
    contrib = jax.lax.dot_general(y, onehot, (((0,), (0,)), ((), ())),
                                  preferred_element_type=jnp.float32)     # (1, n_struct_pad)

    out_ref[...] = out_ref[...] + contrib          # broadcast: 8 identical sublanes


# --- Network forward (single fused pallas_call over all species) --------------
def network_forward(tensor_map, original_indices, params_by_species, ncores=None):
    """tensor_map: {species: (features [N_s, nfeat], structure_ids [N_s])}"""
    n_struct = len(original_indices)
    n_struct_pad = _round_up(max(n_struct, 1), 128)
    # TODO(synk): for large n_struct, tile the structure axis with a grid
    # dimension instead of widening the one-hot (v7x: 64 MiB VMEM budget).

    ncores = _default_ncores() if ncores is None else ncores
    pos = {int(s): i for i, s in enumerate(np.asarray(original_indices))}

    # Stack per-species weights along a leading species axis.
    # w4 is pre-transposed to (S, 1, 32) so the kernel can lane-broadcast it.
    w1 = jnp.stack([params_by_species[sp][0] for sp in ALL_SPECIES])
    b1 = jnp.stack([params_by_species[sp][1] for sp in ALL_SPECIES])
    w2 = jnp.stack([params_by_species[sp][2] for sp in ALL_SPECIES])
    b2 = jnp.stack([params_by_species[sp][3] for sp in ALL_SPECIES])
    w3 = jnp.stack([params_by_species[sp][4] for sp in ALL_SPECIES])
    b3 = jnp.stack([params_by_species[sp][5] for sp in ALL_SPECIES])
    w4 = jnp.stack([params_by_species[sp][6].T for sp in ALL_SPECIES])    # (S,1,32)
    b4 = jnp.stack([params_by_species[sp][7] for sp in ALL_SPECIES])      # (S,1,1)

    # Concatenate per-species atoms, each padded to whole TM tiles.
    x_chunks, idx_chunks, tile_species = [], [], []
    for s_id, species in enumerate(ALL_SPECIES):
        if species not in tensor_map:           # mirrors try/except ValueError: continue
            continue
        x, structures = tensor_map[species]
        n_atoms = int(x.shape[0])
        if n_atoms == 0:
            continue
        n_pad = _round_up(n_atoms, TM)
        idx = np.full((n_pad, 1), -1, dtype=np.int32)
        idx[:n_atoms, 0] = [pos[int(s)] for s in np.asarray(structures)]
        x_chunks.append(jnp.pad(jnp.asarray(x, jnp.float32),
                                ((0, n_pad - n_atoms), (0, 0))))
        idx_chunks.append(jnp.asarray(idx))
        tile_species += [s_id] * (n_pad // TM)

    if not x_chunks:
        return jnp.zeros((n_struct, 1), jnp.float32)

    # Pad tile count so all cores get equal work (per-tile cost is uniform).
    n_tiles = len(tile_species)
    tiles_per_core = max(1, _round_up(n_tiles, ncores) // ncores)
    total_tiles = tiles_per_core * ncores
    if total_tiles > n_tiles:
        extra = total_tiles - n_tiles
        x_chunks.append(jnp.zeros((extra * TM, NFEAT), jnp.float32))
        idx_chunks.append(jnp.full((extra * TM, 1), -1, jnp.int32))
        tile_species += [0] * extra

    x_all = jnp.concatenate(x_chunks, axis=0)
    idx_all = jnp.concatenate(idx_chunks, axis=0)
    tile_species = jnp.asarray(tile_species, jnp.int32)

    def atom_map(c, i, ts):
        return (c * tiles_per_core + i, 0)

    def const3(c, i, ts):                       # resident weights: DMA'd once
        return (0, 0, 0)

    out = pl.pallas_call(
        bpnn_fused_kernel,
        out_shape=jax.ShapeDtypeStruct((ncores * 8, n_struct_pad), jnp.float32),
        grid_spec=pltpu.PrefetchScalarGridSpec(
            num_scalar_prefetch=1,
            grid=(ncores, tiles_per_core),
            in_specs=[
                pl.BlockSpec((TM, NFEAT), atom_map),
                pl.BlockSpec((TM, 1), atom_map),
                pl.BlockSpec(w1.shape, const3),
                pl.BlockSpec(b1.shape, const3),
                pl.BlockSpec(w2.shape, const3),
                pl.BlockSpec(b2.shape, const3),
                pl.BlockSpec(w3.shape, const3),
                pl.BlockSpec(b3.shape, const3),
                pl.BlockSpec(w4.shape, const3),
                pl.BlockSpec(b4.shape, const3),
            ],
            out_specs=pl.BlockSpec((8, n_struct_pad), lambda c, i, ts: (c, 0)),
        ),
        compiler_params=pltpu.CompilerParams(
            dimension_semantics=("parallel", "arbitrary")),
        # TODO(synk): on v7x, try pltpu.CORE_PARALLEL on the leading axis if a
        # profile shows "parallel" does not shard across the two TensorCores.
    )(tile_species, x_all, idx_all, w1, b1, w2, b2, w3, b3, w4, b4)

    # Each core wrote 8 identical sublanes; take row 0 of each core block, sum cores.
    per_core = out.reshape(ncores, 8, n_struct_pad)[:, 0, :]
    return per_core.sum(axis=0)[:n_struct].reshape(n_struct, 1)


# --- reference (plain JAX) ----------------------------------------------------
def ref_forward(tensor_map, original_indices, params_by_species):
    n_struct = len(original_indices)
    pos = {int(s): i for i, s in enumerate(np.asarray(original_indices))}
    y_structure = jnp.zeros((n_struct, 1), jnp.float32)
    for species in ALL_SPECIES:
        if species not in tensor_map:
            continue
        x, structures = tensor_map[species]
        idx = np.array([pos[int(s)] for s in np.asarray(structures)], dtype=np.int32)
        w1, b1, w2, b2, w3, b3, w4, b4 = params_by_species[species]
        h = jnp.tanh(x @ w1 + b1)
        h = jnp.tanh(h @ w2 + b2)
        h = jnp.tanh(h @ w3 + b3)
        y = h @ w4 + b4
        y_structure = y_structure.at[jnp.asarray(idx)].add(y)
    return y_structure


# --- deterministic parameter init (PyTorch nn.Linear-style uniform) -----------
def init_linear(key, fan_in, fan_out):
    kw, kb = jax.random.split(key)
    bound = 1.0 / np.sqrt(fan_in)
    w = jax.random.uniform(kw, (fan_in, fan_out), jnp.float32, -bound, bound)
    b = jax.random.uniform(kb, (1, fan_out), jnp.float32, -bound, bound)
    return w, b


def init_params(key):
    params_by_species = {}
    dims = [NFEAT] + NNEURONS + [1]
    for species in ALL_SPECIES:
        key, sub = jax.random.split(key)
        layer_keys = jax.random.split(sub, len(dims) - 1)
        flat = []
        for lk, (fi, fo) in zip(layer_keys, zip(dims[:-1], dims[1:])):
            w, b = init_linear(lk, fi, fo)
            flat += [w, b]
        params_by_species[species] = tuple(flat)
    return params_by_species


# --- demo ----------------------------------------------------------------------
if __name__ == "__main__":
    key = jax.random.PRNGKey(0)
    key, pkey = jax.random.split(key)
    params_by_species = init_params(pkey)

    # Synthetic "tensor_map": two structures (ids 0 and 1), two species.
    original_indices = np.array([0, 1])
    k1, k2 = jax.random.split(key)
    tensor_map = {
        1: (jax.random.normal(k1, (10, NFEAT), jnp.float32),    # 10 H atoms
            np.array([0, 0, 0, 0, 0, 0, 1, 1, 1, 1])),          # their structure ids
        8: (jax.random.normal(k2, (6, NFEAT), jnp.float32),     # 6 O atoms
            np.array([0, 0, 0, 1, 1, 1])),
    }

    y = network_forward(tensor_map, original_indices, params_by_species)
    y = jax.block_until_ready(y)

    y_ref = ref_forward(tensor_map, original_indices, params_by_species)
    np.testing.assert_allclose(np.asarray(y), np.asarray(y_ref), rtol=1e-5, atol=1e-5)

    print("KERNEL_OK")
</pallas_src>

<mosaic_0001>
module attributes {stable_mosaic.version = 11 : i64} {
  func.func @bpnn_fused_kernel(%arg0: i32, %arg1: i32, %arg2: memref<2xi32, #tpu.memory_space<smem>>, %arg3: memref<512x16xf32, #tpu.memory_space<vmem>>, %arg4: memref<512x1xi32, #tpu.memory_space<vmem>>, %arg5: memref<2x16x32xf32, #tpu.memory_space<vmem>>, %arg6: memref<2x1x32xf32, #tpu.memory_space<vmem>>, %arg7: memref<2x32x32xf32, #tpu.memory_space<vmem>>, %arg8: memref<2x1x32xf32, #tpu.memory_space<vmem>>, %arg9: memref<2x32x32xf32, #tpu.memory_space<vmem>>, %arg10: memref<2x1x32xf32, #tpu.memory_space<vmem>>, %arg11: memref<2x1x32xf32, #tpu.memory_space<vmem>>, %arg12: memref<2x1x1xf32, #tpu.memory_space<vmem>>, %arg13: memref<8x128xf32, #tpu.memory_space<vmem>>) attributes {dimension_semantics = [#tpu.dimension_semantics<parallel>, #tpu.dimension_semantics<arbitrary>], iteration_bounds = array<i64: 1, 2>, scalar_prefetch = 1 : i64, scratch_operands = 0 : i64, tpu.core_type = #tpu.core_type<tc>, window_params = [{transform_indices = @transform_0, window_bounds = array<i64: 512, 16>}, {transform_indices = @transform_1, window_bounds = array<i64: 512, 1>}, {pipeline_mode = #tpu.pipeline_mode<synchronous>, transform_indices = @transform_2, window_bounds = array<i64: 2, 16, 32>}, {pipeline_mode = #tpu.pipeline_mode<synchronous>, transform_indices = @transform_3, window_bounds = array<i64: 2, 1, 32>}, {pipeline_mode = #tpu.pipeline_mode<synchronous>, transform_indices = @transform_4, window_bounds = array<i64: 2, 32, 32>}, {pipeline_mode = #tpu.pipeline_mode<synchronous>, transform_indices = @transform_5, window_bounds = array<i64: 2, 1, 32>}, {pipeline_mode = #tpu.pipeline_mode<synchronous>, transform_indices = @transform_6, window_bounds = array<i64: 2, 32, 32>}, {pipeline_mode = #tpu.pipeline_mode<synchronous>, transform_indices = @transform_7, window_bounds = array<i64: 2, 1, 32>}, {pipeline_mode = #tpu.pipeline_mode<synchronous>, transform_indices = @transform_8, window_bounds = array<i64: 2, 1, 32>}, {pipeline_mode = #tpu.pipeline_mode<synchronous>, transform_indices = @transform_9, window_bounds = array<i64: 2, 1, 1>}, {transform_indices = @transform_10, window_bounds = array<i64: 8, 128>}]} {
    %c0_i32 = arith.constant 0 : i32
    %0 = arith.cmpi eq, %arg1, %c0_i32 : i32
    %1 = arith.extui %0 : i1 to i32
    %c0_i32_0 = arith.constant 0 : i32
    %2 = arith.cmpi ne, %1, %c0_i32_0 : i32
    scf.if %2 {
      %cst_28 = arith.constant 0.000000e+00 : f32
      %62 = vector.broadcast %cst_28 : f32 to vector<8x128xf32>
      %c0_29 = arith.constant 0 : index
      %c0_30 = arith.constant 0 : index
      %63 = vector.load %arg13[%c0_29, %c0_30] : memref<8x128xf32, #tpu.memory_space<vmem>>, vector<8x128xf32>
      tpu.vector_store %arg13[%c0_29, %c0_30], %62 {strides = array<i32>} : memref<8x128xf32, #tpu.memory_space<vmem>>, vector<8x128xf32>,
    } else {
    }
    %c2_i32 = arith.constant 2 : i32
    %3 = arith.muli %arg0, %c2_i32 : i32
    %4 = arith.addi %3, %arg1 : i32
    %5 = arith.index_cast %4 : i32 to index
    %6 = memref.load %arg2[%5] : memref<2xi32, #tpu.memory_space<smem>>
    %c0 = arith.constant 0 : index
    %c0_1 = arith.constant 0 : index
    %7 = vector.load %arg3[%c0, %c0_1] : memref<512x16xf32, #tpu.memory_space<vmem>>, vector<512x16xf32>
    %8 = arith.index_cast %6 : i32 to index
    %c0_2 = arith.constant 0 : index
    %c0_3 = arith.constant 0 : index
    %9 = vector.load %arg5[%8, %c0_2, %c0_3] : memref<2x16x32xf32, #tpu.memory_space<vmem>>, vector<1x16x32xf32>
    %10 = vector.shape_cast %9 : vector<1x16x32xf32> to vector<16x32xf32>
    %cst = arith.constant dense<0.000000e+00> : vector<512x32xf32>
    %11 = tpu.matmul %7, %10, %cst {dimension_numbers = #tpu.dot_dimension_numbers<[1], [0], [0], [1], [0, 0, 1, 1], [], []>} : vector<512x16xf32>, vector<16x32xf32>, vector<512x32xf32> -> vector<512x32xf32>
    %12 = arith.index_cast %6 : i32 to index
    %c0_4 = arith.constant 0 : index
    %c0_5 = arith.constant 0 : index
    %13 = vector.load %arg6[%12, %c0_4, %c0_5] : memref<2x1x32xf32, #tpu.memory_space<vmem>>, vector<1x1x32xf32>
    %14 = vector.shape_cast %13 : vector<1x1x32xf32> to vector<1x32xf32>
    %15 = vector.broadcast %14 : vector<1x32xf32> to vector<512x32xf32>
    %16 = arith.addf %11, %15 : vector<512x32xf32>
    %17 = math.tanh %16 : vector<512x32xf32>
    %18 = arith.index_cast %6 : i32 to index
    %c0_6 = arith.constant 0 : index
    %c0_7 = arith.constant 0 : index
    %19 = vector.load %arg7[%18, %c0_6, %c0_7] : memref<2x32x32xf32, #tpu.memory_space<vmem>>, vector<1x32x32xf32>
    %20 = vector.shape_cast %19 : vector<1x32x32xf32> to vector<32x32xf32>
    %cst_8 = arith.constant dense<0.000000e+00> : vector<512x32xf32>
    %21 = tpu.matmul %17, %20, %cst_8 {dimension_numbers = #tpu.dot_dimension_numbers<[1], [0], [0], [1], [0, 0, 1, 1], [], []>} : vector<512x32xf32>, vector<32x32xf32>, vector<512x32xf32> -> vector<512x32xf32>
    %22 = arith.index_cast %6 : i32 to index
    %c0_9 = arith.constant 0 : index
    %c0_10 = arith.constant 0 : index
    %23 = vector.load %arg8[%22, %c0_9, %c0_10] : memref<2x1x32xf32, #tpu.memory_space<vmem>>, vector<1x1x32xf32>
    %24 = vector.shape_cast %23 : vector<1x1x32xf32> to vector<1x32xf32>
    %25 = vector.broadcast %24 : vector<1x32xf32> to vector<512x32xf32>
    %26 = arith.addf %21, %25 : vector<512x32xf32>
    %27 = math.tanh %26 : vector<512x32xf32>
    %28 = arith.index_cast %6 : i32 to index
    %c0_11 = arith.constant 0 : index
    %c0_12 = arith.constant 0 : index
    %29 = vector.load %arg9[%28, %c0_11, %c0_12] : memref<2x32x32xf32, #tpu.memory_space<vmem>>, vector<1x32x32xf32>
    %30 = vector.shape_cast %29 : vector<1x32x32xf32> to vector<32x32xf32>
    %cst_13 = arith.constant dense<0.000000e+00> : vector<512x32xf32>
    %31 = tpu.matmul %27, %30, %cst_13 {dimension_numbers = #tpu.dot_dimension_numbers<[1], [0], [0], [1], [0, 0, 1, 1], [], []>} : vector<512x32xf32>, vector<32x32xf32>, vector<512x32xf32> -> vector<512x32xf32>
    %32 = arith.index_cast %6 : i32 to index
    %c0_14 = arith.constant 0 : index
    %c0_15 = arith.constant 0 : index
    %33 = vector.load %arg10[%32, %c0_14, %c0_15] : memref<2x1x32xf32, #tpu.memory_space<vmem>>, vector<1x1x32xf32>
    %34 = vector.shape_cast %33 : vector<1x1x32xf32> to vector<1x32xf32>
    %35 = vector.broadcast %34 : vector<1x32xf32> to vector<512x32xf32>
    %36 = arith.addf %31, %35 : vector<512x32xf32>
    %37 = math.tanh %36 : vector<512x32xf32>
    %38 = arith.index_cast %6 : i32 to index
    %c0_16 = arith.constant 0 : index
    %c0_17 = arith.constant 0 : index
    %39 = vector.load %arg11[%38, %c0_16, %c0_17] : memref<2x1x32xf32, #tpu.memory_space<vmem>>, vector<1x1x32xf32>
    %40 = vector.shape_cast %39 : vector<1x1x32xf32> to vector<1x32xf32>
    %41 = vector.broadcast %40 : vector<1x32xf32> to vector<512x32xf32>
    %42 = arith.mulf %37, %41 : vector<512x32xf32>
    %cst_18 = arith.constant dense<0.000000e+00> : vector<512xf32>
    %43 = vector.multi_reduction <add>, %42, %cst_18 [1] : vector<512x32xf32> to vector<512xf32>
    %44 = vector.shape_cast %43 : vector<512xf32> to vector<512x1xf32>
    %45 = arith.index_cast %6 : i32 to index
    %c0_19 = arith.constant 0 : index
    %c0_20 = arith.constant 0 : index
    %46 = vector.load %arg12[%45, %c0_19, %c0_20] : memref<2x1x1xf32, #tpu.memory_space<vmem>>, vector<1x1x1xf32>
    %47 = vector.shape_cast %46 : vector<1x1x1xf32> to vector<1x1xf32>
    %48 = vector.broadcast %47 : vector<1x1xf32> to vector<512x1xf32>
    %49 = arith.addf %44, %48 : vector<512x1xf32>
    %50 = tpu.iota {dimensions = array<i32: 1>} : vector<1x128xi32>
    %c0_21 = arith.constant 0 : index
    %c0_22 = arith.constant 0 : index
    %51 = vector.load %arg4[%c0_21, %c0_22] : memref<512x1xi32, #tpu.memory_space<vmem>>, vector<512x1xi32>
    %52 = vector.broadcast %51 : vector<512x1xi32> to vector<512x128xi32>
    %53 = vector.broadcast %50 : vector<1x128xi32> to vector<512x128xi32>
    %54 = arith.cmpi eq, %52, %53 : vector<512x128xi32>
    %55 = arith.extui %54 : vector<512x128xi1> to vector<512x128xi32>
    %56 = arith.sitofp %55 : vector<512x128xi32> to vector<512x128xf32>
    %cst_23 = arith.constant dense<0.000000e+00> : vector<1x128xf32>
    %57 = tpu.matmul %49, %56, %cst_23 {dimension_numbers = #tpu.dot_dimension_numbers<[0], [0], [1], [1], [0, 1, 1, 1], [], []>} : vector<512x1xf32>, vector<512x128xf32>, vector<1x128xf32> -> vector<1x128xf32>
    %c0_24 = arith.constant 0 : index
    %c0_25 = arith.constant 0 : index
    %58 = vector.load %arg13[%c0_24, %c0_25] : memref<8x128xf32, #tpu.memory_space<vmem>>, vector<8x128xf32>
    %59 = vector.broadcast %57 : vector<1x128xf32> to vector<8x128xf32>
    %60 = arith.addf %58, %59 : vector<8x128xf32>
    %c0_26 = arith.constant 0 : index
    %c0_27 = arith.constant 0 : index
    %61 = vector.load %arg13[%c0_26, %c0_27] : memref<8x128xf32, #tpu.memory_space<vmem>>, vector<8x128xf32>
    tpu.vector_store %arg13[%c0_26, %c0_27], %60 {strides = array<i32>} : memref<8x128xf32, #tpu.memory_space<vmem>>, vector<8x128xf32>,
    return
  }
  func.func @transform_0(%arg0: i32, %arg1: i32, %arg2: memref<2xi32, #tpu.memory_space<smem>>) -> (i32, i32) {
    %c2_i32 = arith.constant 2 : i32
    %0 = arith.muli %arg0, %c2_i32 : i32
    %1 = arith.addi %0, %arg1 : i32
    %c0_i32 = arith.constant 0 : i32
    %c0_i32_0 = arith.constant 0 : i32
    return %1, %c0_i32 : i32, i32
  }
  func.func @transform_1(%arg0: i32, %arg1: i32, %arg2: memref<2xi32, #tpu.memory_space<smem>>) -> (i32, i32) {
    %c2_i32 = arith.constant 2 : i32
    %0 = arith.muli %arg0, %c2_i32 : i32
    %1 = arith.addi %0, %arg1 : i32
    %c0_i32 = arith.constant 0 : i32
    %c0_i32_0 = arith.constant 0 : i32
    return %1, %c0_i32 : i32, i32
  }
  func.func @transform_2(%arg0: i32, %arg1: i32, %arg2: memref<2xi32, #tpu.memory_space<smem>>) -> (i32, i32, i32) {
    %c0_i32 = arith.constant 0 : i32
    %c0_i32_0 = arith.constant 0 : i32
    %c0_i32_1 = arith.constant 0 : i32
    %c0_i32_2 = arith.constant 0 : i32
    return %c0_i32, %c0_i32_0, %c0_i32_1 : i32, i32, i32
  }
  func.func @transform_3(%arg0: i32, %arg1: i32, %arg2: memref<2xi32, #tpu.memory_space<smem>>) -> (i32, i32, i32) {
    %c0_i32 = arith.constant 0 : i32
    %c0_i32_0 = arith.constant 0 : i32
    %c0_i32_1 = arith.constant 0 : i32
    %c0_i32_2 = arith.constant 0 : i32
    return %c0_i32, %c0_i32_0, %c0_i32_1 : i32, i32, i32
  }
  func.func @transform_4(%arg0: i32, %arg1: i32, %arg2: memref<2xi32, #tpu.memory_space<smem>>) -> (i32, i32, i32) {
    %c0_i32 = arith.constant 0 : i32
    %c0_i32_0 = arith.constant 0 : i32
    %c0_i32_1 = arith.constant 0 : i32
    %c0_i32_2 = arith.constant 0 : i32
    return %c0_i32, %c0_i32_0, %c0_i32_1 : i32, i32, i32
  }
  func.func @transform_5(%arg0: i32, %arg1: i32, %arg2: memref<2xi32, #tpu.memory_space<smem>>) -> (i32, i32, i32) {
    %c0_i32 = arith.constant 0 : i32
    %c0_i32_0 = arith.constant 0 : i32
    %c0_i32_1 = arith.constant 0 : i32
    %c0_i32_2 = arith.constant 0 : i32
    return %c0_i32, %c0_i32_0, %c0_i32_1 : i32, i32, i32
  }
  func.func @transform_6(%arg0: i32, %arg1: i32, %arg2: memref<2xi32, #tpu.memory_space<smem>>) -> (i32, i32, i32) {
    %c0_i32 = arith.constant 0 : i32
    %c0_i32_0 = arith.constant 0 : i32
    %c0_i32_1 = arith.constant 0 : i32
    %c0_i32_2 = arith.constant 0 : i32
    return %c0_i32, %c0_i32_0, %c0_i32_1 : i32, i32, i32
  }
  func.func @transform_7(%arg0: i32, %arg1: i32, %arg2: memref<2xi32, #tpu.memory_space<smem>>) -> (i32, i32, i32) {
    %c0_i32 = arith.constant 0 : i32
    %c0_i32_0 = arith.constant 0 : i32
    %c0_i32_1 = arith.constant 0 : i32
    %c0_i32_2 = arith.constant 0 : i32
    return %c0_i32, %c0_i32_0, %c0_i32_1 : i32, i32, i32
  }
  func.func @transform_8(%arg0: i32, %arg1: i32, %arg2: memref<2xi32, #tpu.memory_space<smem>>) -> (i32, i32, i32) {
    %c0_i32 = arith.constant 0 : i32
    %c0_i32_0 = arith.constant 0 : i32
    %c0_i32_1 = arith.constant 0 : i32
    %c0_i32_2 = arith.constant 0 : i32
    return %c0_i32, %c0_i32_0, %c0_i32_1 : i32, i32, i32
  }
  func.func @transform_9(%arg0: i32, %arg1: i32, %arg2: memref<2xi32, #tpu.memory_space<smem>>) -> (i32, i32, i32) {
    %c0_i32 = arith.constant 0 : i32
    %c0_i32_0 = arith.constant 0 : i32
    %c0_i32_1 = arith.constant 0 : i32
    %c0_i32_2 = arith.constant 0 : i32
    return %c0_i32, %c0_i32_0, %c0_i32_1 : i32, i32, i32
  }
  func.func @transform_10(%arg0: i32, %arg1: i32, %arg2: memref<2xi32, #tpu.memory_space<smem>>) -> (i32, i32) {
    %c0_i32 = arith.constant 0 : i32
    %c0_i32_0 = arith.constant 0 : i32
    return %arg0, %c0_i32 : i32, i32
  }
}

</mosaic_0001>

<bundles_post_ra>
// kernel: tpu_custom_call.1
= control target key start
LH: loop header
LB: loop body
LE: loop exit
PB: predicated region body
PF: predicated region fallthrough
CT: control target
= control target key end

     0   :  { %s6611_s0 = inlined_call_operand.vmem [shape: s32[2], index: 0, kind: input, shape index: {}]   ;;  %s6612_s1 = inlined_call_operand.vmem [shape: f32[1024,16], index: 1, kind: input, shape index: {}]   ;;  %s6613_s2 = inlined_call_operand.vmem [shape: s32[1024,1], index: 2, kind: input, shape index: {}]   ;;  %s6614_s3 = inlined_call_operand.vmem [shape: f32[2,16,32], index: 3, kind: input, shape index: {}]   ;;  %s6615_s4 = inlined_call_operand.vmem [shape: f32[2,1,32], index: 4, kind: input, shape index: {}]   ;;  %s6616_s5 = inlined_call_operand.vmem [shape: f32[2,32,32], index: 5, kind: input, shape index: {}]   ;;  %s6617_s6 = inlined_call_operand.vmem [shape: f32[2,1,32], index: 6, kind: input, shape index: {}]   ;;  %s6618_s7 = inlined_call_operand.vmem [shape: f32[2,32,32], index: 7, kind: input, shape index: {}]   ;;  %s6619_s8 = inlined_call_operand.vmem [shape: f32[2,1,32], index: 8, kind: input, shape index: {}]   ;;  %s6620_s9 = inlined_call_operand.vmem [shape: f32[2,1,32], index: 9, kind: input, shape index: {}]   ;;  %s6621_s10 = inlined_call_operand.vmem [shape: f32[2,1,1], index: 10, kind: input, shape index: {}]   ;;  %s6622_s11 = inlined_call_operand.hbm [shape: f32[8,128], index: 11, kind: output, shape index: {}]  }
   0x1   :  { %s16_s19 = sshll.u32 %s6611_s0, 4  ;;  %s17_s19 = int_to_ptr.vmem [resolvable:$true] %s16_s19 }
   0x2   :  { %s5102_s20 = scalar_lea.vmem %s17_s19, 16  ;;  %p5107_p1 = scmp.lt.s32.totalorder %s17_s19, %s17_s19 }
   0x3   :  { %p5103_p0 = scmp.ne.s32.totalorder %s17_s19, %s5102_s20  ;;  %p5108_p2 = scmp.lt.s32.totalorder %s5102_s20, %s5102_s20 }
   0x5   :  { %p5109_p3 = por %p5108_p2, %p5107_p1 }
   0x7   :  { %p5110_p4 = pnand %p5109_p3, %p5103_p0 }
   0x9   :  { %5113 = shalt.err (!%p5110_p4)  }
   0xa   :  { %s5170_s21 = smov [#allocation3]  }
   0xb   :  { %19 = dma.vmem_to_smem %s17_s19, 16, %s5170_s21, [#allocation2] }
   0xc   :  { %5152 = dma.done.wait [#allocation2], 16 }
   0xd   :  { %5153 = vsyncadd [#allocation2], 4294967280 }
   0xe   :  { %21 = sfence }
   0xf   :  { %22 = vsyncpa [#allocation5], 0  ;;  %s5238_s22 = smov 0   ;;  %s5240_s23 = smov 0  }
  0x10   :  { %s5242_s24 = smov 0  }
  0x11 LB: > { %s3601_s0 = sadd.s32 4294967295, %s5168_s24   ;;  %s37_s25 = sadd.s32 1, %s5164_s23  ;;  %s5168_s24 = sphi %s5242_s24, %s28_s24   ;;  %s5164_s23 = sphi %s5240_s23, %s6684_s23   ;;  %s5160_s22 = sphi %s5238_s22, %s6683_s22  }
  0x12   : > { %p38_p5 = scmp.ge.s32.totalorder %s37_s25, 2  ;;  %p3604_p6 = scmp.ge.s32.totalorder %s5168_s24, 1 }
  0x13   : > { %p360_p7 = scmp.lt.s32.totalorder %s5168_s24, 3 }
  0x14   : > { %s6686_s25 = smov (%p38_p5, %s37_s25), 0 }
  0x15   : > { %p361_p8 = pnand %p3604_p6, %p360_p7 }
  0x16   : > { %s3605_s26 = sshll.u32 (!%p361_p8), %s5160_s22, 6  ;;  %p3609_p10 = scmp.ne.s32.totalorder (!%p361_p8), %s5160_s22, 0 }
  0x17   : > { %364 = sbr.rel (%p361_p8) target bundleno = 1345 (0x541), region = 60  ;;  %p405_p9 = scmp.lt.s32.totalorder (!%p361_p8), %s3605_s26, 127 }
  0x1e   : > { %s6688_s26 = smov (!%p405_p9, %s3605_s26), 127  ;;  %425 = sbr.rel (%p3609_p10) target bundleno = 37 (0x25), region = 64 }
  0x1f   : > { %s3606_s27 = sshll.u32 %s6688_s26, 3  ;;  %v5171_v0 = vmov (!%p3609_p10), 0.0  }
  0x20   : > { %s5260_s30 = scalar_lea.vmem %s6612_s1, %s3606_s27  ;;  %s5265_s14 = scalar_lea.vmem %s6613_s2, %s3606_s27  ;;  %426 = vst [vmem:[#allocation4] sm:$0xff] (!%p3609_p10), %v5171_v0 }
  0x25 PF: > { %s5267_s15 = sld [smem:[#allocation3 + %s5160_s22]]  ;;  %v430_v1 = vld [vmem:[%s5260_s30] sm:$0xff]  ;;  %vm506_vm0 = vcmask 130048   ;;  %v431_v5 = vld [vmem:[%s5260_s30 + $0x8] sm:$0xff]  ;;  %v432_v6 = vld [vmem:[%s5260_s30 + $0x10] sm:$0xff]  ;;  %vm1162_vm1 = vcmask 261120  }
  0x26   : > { %4217 = vmatprep.mubr.msk.f32.mxu0 %vm506_vm0, %v430_v1  ;;  %v433_v7 = vld [vmem:[%s5260_s30 + $0x18] sm:$0xff]  ;;  %v472_v8 = vld [vmem:[%s5260_s30 + $0x150] sm:$0xff]  ;;  %v434_v10 = vld [vmem:[%s5260_s30 + $0x20] sm:$0xff]  ;;  %p6576_p11 = scmp.eq.s32.totalorder %s3601_s0, 1 }
  0x27   : > { %v473_v9 = vld [vmem:[%s5260_s30 + $0x158] sm:$0xff]  ;;  %4280 = vmatprep.mubr.msk.f32.mxu1 %vm506_vm0, %v472_v8  ;;  %v474_v11 = vld [vmem:[%s5260_s30 + $0x160] sm:$0xff]  ;;  %v475_v12 = vld [vmem:[%s5260_s30 + $0x168] sm:$0xff] }
  0x28   : > { %v435_v13 = vld [vmem:[%s5260_s30 + $0x28] sm:$0xff]  ;;  %v476_v14 = vld [vmem:[%s5260_s30 + $0x170] sm:$0xff]  ;;  %v437_v16 = vld [vmem:[%s5260_s30 + $0x38] sm:$0xff] }
  0x29   : > { %v436_v15 = vld [vmem:[%s5260_s30 + $0x30] sm:$0xff]  ;;  %v477_v17 = vld [vmem:[%s5260_s30 + $0x178] sm:$0xff]  ;;  %v478_v18 = vld [vmem:[%s5260_s30 + $0x180] sm:$0xff] }
  0x2a   : > { %v438_v23 = vld [vmem:[%s5260_s30 + $0x40] sm:$0xff]  ;;  %v479_v26 = vld [vmem:[%s5260_s30 + $0x188] sm:$0xff]  ;;  %v480_v28 = vld [vmem:[%s5260_s30 + $0x190] sm:$0xff] }
  0x2b   : > { %s3610_s16 = sshll.u32 %s5267_s15, 4  ;;  %s3676_s20 = sshll.u32 %s5267_s15, 5  ;;  %v439_v27 = vld [vmem:[%s5260_s30 + $0x48] sm:$0xff]  ;;  %v440_v29 = vld [vmem:[%s5260_s30 + $0x50] sm:$0xff]  ;;  %v481_v30 = vld [vmem:[%s5260_s30 + $0x198] sm:$0xff] }
  0x2c   : > { %s495_s19 = scalar_lea.vmem %s6614_s3, %s3610_s16  ;;  %s1149_s26 = scalar_lea.vmem %s6616_s5, %s3676_s20  ;;  %v441_v31 = vld [vmem:[%s5260_s30 + $0x58] sm:$0xff]  ;;  %v482_v32 = vld [vmem:[%s5260_s30 + $0x1a0] sm:$0xff]  ;;  %v483_v34 = vld [vmem:[%s5260_s30 + $0x1a8] sm:$0xff] }
  0x2d   : > { %v496_v2 = vld [vmem:[%s495_s19] sm:$0xff]  ;;  %v497_v3 = vld [vmem:[%s495_s19 + $0x8] sm:$0xff]  ;;  %v1152_v21 = vld [vmem:[%s1149_s26 + $0x10] sm:$0xff]  ;;  %s498_s29 = scalar_lea.vmem %s6615_s4, %s5267_s15  ;;  %s1804_s13 = scalar_lea.vmem %s6618_s7, %s3676_s20 }
  0x2e   : > { %v4521_v4 = vpack.c.bf16 %v497_v3, %v496_v2  ;;  %v1150_v19 = vld [vmem:[%s1149_s26] sm:$0xff]  ;;  %v1151_v20 = vld [vmem:[%s1149_s26 + $0x8] sm:$0xff]  ;;  %v1153_v22 = vld [vmem:[%s1149_s26 + $0x18] sm:$0xff]  ;;  %s1154_s17 = scalar_lea.vmem %s6617_s6, %s5267_s15  ;;  %s1809_s20 = scalar_lea.vmem %s6619_s8, %s5267_s15 }
  0x2f   : > { %v4525_v24 = vpack.c.bf16 %v1151_v20, %v1150_v19  ;;  %v4529_v25 = vpack.c.bf16 %v1153_v22, %v1152_v21  ;;  %v442_v33 = vld [vmem:[%s5260_s30 + $0x60] sm:$0xff]  ;;  %v443_v35 = vld [vmem:[%s5260_s30 + $0x68] sm:$0xff]  ;;  %v484_v36 = vld [vmem:[%s5260_s30 + $0x1b0] sm:$0xff]  ;;  %s2458_s26 = scalar_lea.vmem %s6620_s9, %s5267_s15 }
  0x30   : > { %4522 = vmatprep.subr.bf16.mxu0 %v4521_v4  ;;  %4605 = vmatprep.subr.bf16.mxu1 %v4521_v4  ;;  %v444_v37 = vld [vmem:[%s5260_s30 + $0x70] sm:$0xff]  ;;  %v485_v38 = vld [vmem:[%s5260_s30 + $0x1b8] sm:$0xff]  ;;  %v486_v40 = vld [vmem:[%s5260_s30 + $0x1c0] sm:$0xff] }
  0x31   : > { %4524 = vmatpush3.bf16.msra.mxu0 %v4521_v4  ;;  %4606 = vmatpush3.bf16.msra.mxu1 %v4521_v4  ;;  %v445_v39 = vld [vmem:[%s5260_s30 + $0x78] sm:$0xff]  ;;  %v446_v41 = vld [vmem:[%s5260_s30 + $0x80] sm:$0xff]  ;;  %v487_v42 = vld [vmem:[%s5260_s30 + $0x1c8] sm:$0xff] }
  0x32   : > { %4526 = vmatprep.subr.bf16.mxu1 %v4525_v24  ;;  %v447_v43 = vld [vmem:[%s5260_s30 + $0x88] sm:$0xff]  ;;  %v488_v44 = vld [vmem:[%s5260_s30 + $0x1d0] sm:$0xff]  ;;  %v489_v46 = vld [vmem:[%s5260_s30 + $0x1d8] sm:$0xff] }
  0x33   : > { %v448_v45 = vld [vmem:[%s5260_s30 + $0x90] sm:$0xff]  ;;  %v449_v47 = vld [vmem:[%s5260_s30 + $0x98] sm:$0xff]  ;;  %v490_v48 = vld [vmem:[%s5260_s30 + $0x1e0] sm:$0xff] }
  0x34   : > { %4218 = vmatmul.mubr.msk.f32.vlgmr.msra.gmra.mrb[0].mxu0 %vm506_vm0, %v431_v5  ;;  %4281 = vmatmul.mubr.msk.f32.vlgmr.msra.gmra.mrb[0].mxu1 %vm506_vm0, %v473_v9  ;;  %v450_v49 = vld [vmem:[%s5260_s30 + $0xa0] sm:$0xff]  ;;  %v491_v50 = vld [vmem:[%s5260_s30 + $0x1e8] sm:$0xff]  ;;  %v492_v52 = vld [vmem:[%s5260_s30 + $0x1f0] sm:$0xff] }
  0x35   : > { %4220 = vmatprep.mubr.msk.f32.mxu0 %vm506_vm0, %v432_v6  ;;  %4283 = vmatprep.mubr.msk.f32.mxu1 %vm506_vm0, %v474_v11  ;;  %v451_v51 = vld [vmem:[%s5260_s30 + $0xa8] sm:$0xff]  ;;  %v452_v53 = vld [vmem:[%s5260_s30 + $0xb0] sm:$0xff]  ;;  %v493_v54 = vld [vmem:[%s5260_s30 + $0x1f8] sm:$0xff] }
  0x36   : > { %4528 = vmatpush3.bf16.msra.mxu1 %v4525_v24  ;;  %v453_v55 = vld [vmem:[%s5260_s30 + $0xb8] sm:$0xff]  ;;  %v454_v56 = vld [vmem:[%s5260_s30 + $0xc0] sm:$0xff]  ;;  %v455_v57 = vld [vmem:[%s5260_s30 + $0xc8] sm:$0xff] }
  0x37   : > { %4530 = vmatprep.subr.bf16.mxu1 %v4529_v25  ;;  %v456_v58 = vld [vmem:[%s5260_s30 + $0xd0] sm:$0xff]  ;;  %v457_v59 = vld [vmem:[%s5260_s30 + $0xd8] sm:$0xff]  ;;  %v458_v60 = vld [vmem:[%s5260_s30 + $0xe0] sm:$0xff] }
  0x38   : > { %4221 = vmatmul.mubr.msk.f32.gmra.mrb[2].mxu0 %vm506_vm0, %v433_v7  ;;  %4284 = vmatmul.mubr.msk.f32.gmra.mrb[2].mxu1 %vm506_vm0, %v475_v12  ;;  %v459_v61 = vld [vmem:[%s5260_s30 + $0xe8] sm:$0xff]  ;;  %v460_v62 = vld [vmem:[%s5260_s30 + $0xf0] sm:$0xff]  ;;  %v461_v63 = vld [vmem:[%s5260_s30 + $0xf8] sm:$0xff] }
  0x39   : > { %4223 = vmatprep.mubr.msk.f32.mxu0 %vm506_vm0, %v434_v10  ;;  %4286 = vmatprep.mubr.msk.f32.mxu1 %vm506_vm0, %v476_v14  ;;  %v462_v0 = vld [vmem:[%s5260_s30 + $0x100] sm:$0xff]  ;;  %v463_v1 = vld [vmem:[%s5260_s30 + $0x108] sm:$0xff]  ;;  %v464_v2 = vld [vmem:[%s5260_s30 + $0x110] sm:$0xff] }
  0x3a   : > { %4532 = vmatpush3.bf16.msra.mxu1 %v4529_v25  ;;  %v465_v3 = vld [vmem:[%s5260_s30 + $0x118] sm:$0xff]  ;;  %v466_v4 = vld [vmem:[%s5260_s30 + $0x120] sm:$0xff]  ;;  %v467_v5 = vld [vmem:[%s5260_s30 + $0x128] sm:$0xff] }
  0x3b   : > { %v468_v6 = vld [vmem:[%s5260_s30 + $0x130] sm:$0xff]  ;;  %v469_v7 = vld [vmem:[%s5260_s30 + $0x138] sm:$0xff]  ;;  %v470_v8 = vld [vmem:[%s5260_s30 + $0x140] sm:$0xff] }
  0x3c   : > { %4224 = vmatmul.mubr.msk.f32.gmra.mrb[4].mxu0 %vm506_vm0, %v435_v13  ;;  %4287 = vmatmul.mubr.msk.f32.gmra.mrb[4].mxu1 %vm506_vm0, %v477_v17  ;;  %v471_v9 = vld [vmem:[%s5260_s30 + $0x148] sm:$0xff]  ;;  %v5411_v10 = vld [vmem:[%s498_s29] ss:$0 sm:$0xff]  ;;  %s2722_s29 = scalar_lea.vmem %s6621_s10, %s5267_s15  ;;  %s5174_s15 = smov [#allocation4]  }
  0x3d   : > { %4226 = vmatprep.mubr.msk.f32.mxu0 %vm506_vm0, %v436_v15  ;;  %4289 = vmatprep.mubr.msk.f32.mxu1 %vm506_vm0, %v478_v18  ;;  %s3528_s30 = sshll.u32 %s5174_s15, 4  ;;  %s3529_s30 = int_to_ptr.vmem [resolvable:$true] %s3528_s30 }
  0x3e   : > { %p5121_p1 = scmp.lt.s32.totalorder %s3529_s30, %s3529_s30 }
  0x40   : > { %4227 = vmatmul.mubr.msk.f32.gmra.mrb[6].mxu0 %vm506_vm0, %v437_v16  ;;  %4290 = vmatmul.mubr.msk.f32.gmra.mrb[6].mxu1 %vm506_vm0, %v479_v26 }
  0x41   : > { %4229 = vmatprep.mubr.msk.f32.mxu0 %vm506_vm0, %v438_v23  ;;  %4292 = vmatprep.mubr.msk.f32.mxu1 %vm506_vm0, %v480_v28 }
  0x44   : > { %4230 = vmatmul.mubr.msk.f32.gmra.mrb[8].mxu0 %vm506_vm0, %v439_v27  ;;  %4293 = vmatmul.mubr.msk.f32.gmra.mrb[8].mxu1 %vm506_vm0, %v481_v30  ;;  %v2797_v30 = vld [vmem:[%s5265_s14 + $0x8] sm:$0xff] }
  0x45   : > { %4232 = vmatprep.mubr.msk.f32.mxu0 %vm506_vm0, %v440_v29  ;;  %4295 = vmatprep.mubr.msk.f32.mxu1 %vm506_vm0, %v482_v32 }
  0x48   : > { %4233 = vmatmul.mubr.msk.f32.gmra.mrb[10].mxu0 %vm506_vm0, %v441_v31  ;;  %4296 = vmatmul.mubr.msk.f32.gmra.mrb[10].mxu1 %vm506_vm0, %v483_v34  ;;  %v1806_v34 = vld [vmem:[%s1804_s13 + $0x8] sm:$0xff] }
  0x49   : > { %4235 = vmatprep.mubr.msk.f32.mxu0 %vm506_vm0, %v442_v33  ;;  %4298 = vmatprep.mubr.msk.f32.mxu1 %vm506_vm0, %v484_v36  ;;  %v1805_v33 = vld [vmem:[%s1804_s13] sm:$0xff] }
  0x4c   : > { %4236 = vmatmul.mubr.msk.f32.gmra.mrb[12].mxu0 %vm506_vm0, %v443_v35  ;;  %4299 = vmatmul.mubr.msk.f32.gmra.mrb[12].mxu1 %vm506_vm0, %v485_v38  ;;  %v5172_v35 = vmov 0   ;;  %v4533_v38 = vpack.c.bf16 %v1806_v34, %v1805_v33 }
  0x4d   : > { %4238 = vmatprep.mubr.msk.f32.mxu0 %vm506_vm0, %v444_v37  ;;  %4301 = vmatprep.mubr.msk.f32.mxu1 %vm506_vm0, %v486_v40 }
  0x4e   : > { %4643 = vset.pattern.permute.xlu1 %v5172_v35  ;;  %4642 = vset.pattern.permute.xlu0 %v5172_v35  ;;  %v2818_v35 = vld [vmem:[%s5265_s14 + $0xb0] sm:$0xff] }
  0x4f   : > { %2864 = vperm.xlu1 %4643, %v2797_v30   ;;  %4534 = vmatprep.subr.bf16.mxu0 %v4533_v38 }
  0x50   : > { %4239 = vmatmul.mubr.msk.f32.gmra.mrb[14].mxu0 %vm506_vm0, %v445_v39  ;;  %4302 = vmatmul.mubr.msk.f32.gmra.mrb[14].mxu1 %vm506_vm0, %v487_v42  ;;  %v2796_v42 = vld [vmem:[%s5265_s14] sm:$0xff] }
  0x51   : > { %4241 = vmatprep.mubr.msk.f32.mxu0 %vm506_vm0, %v446_v41  ;;  %4304 = vmatprep.mubr.msk.f32.mxu1 %vm506_vm0, %v488_v44  ;;  %v2798_v41 = vld [vmem:[%s5265_s14 + $0x10] sm:$0xff] }
  0x52   : > { %4536 = vmatpush3.bf16.msra.mxu0 %v4533_v38  ;;  %2861 = vperm.xlu0 %4642, %v2796_v42   ;;  %v2803_v38 = vld [vmem:[%s5265_s14 + $0x38] sm:$0xff] }
  0x53   : > { %2867 = vperm.xlu1 %4643, %v2798_v41  }
  0x54   : > { %4242 = vmatmul.mubr.msk.f32.gmra.mrb[16].mxu0 %vm506_vm0, %v447_v43  ;;  %4305 = vmatmul.mubr.msk.f32.gmra.mrb[16].mxu1 %vm506_vm0, %v489_v46 }
  0x55   : > { %4244 = vmatprep.mubr.msk.f32.mxu0 %vm506_vm0, %v448_v45  ;;  %4307 = vmatprep.mubr.msk.f32.mxu1 %vm506_vm0, %v490_v48  ;;  %v1807_v45 = vld [vmem:[%s1804_s13 + $0x10] sm:$0xff]  ;;  %v1808_v48 = vld [vmem:[%s1804_s13 + $0x18] sm:$0xff]  ;;  %s5114_s13 = scalar_lea.vmem %s3529_s30, 128 }
  0x56   : > { %p5115_p12 = scmp.ne.s32.totalorder %s3529_s30, %s5114_s13  ;;  %p5122_p2 = scmp.lt.s32.totalorder %s5114_s13, %s5114_s13 }
  0x58   : > { %4245 = vmatmul.mubr.msk.f32.gmra.mrb[18].mxu0 %vm506_vm0, %v449_v47  ;;  %4308 = vmatmul.mubr.msk.f32.gmra.mrb[18].mxu1 %vm506_vm0, %v491_v50  ;;  %p5116_p13 = pnand %p5115_p12, %p6576_p11  ;;  %p5123_p3 = por %p5122_p2, %p5121_p1 }
  0x59   : > { %4247 = vmatprep.mubr.msk.f32.mxu0 %vm506_vm0, %v450_v49  ;;  %4310 = vmatprep.mubr.msk.f32.mxu1 %vm506_vm0, %v492_v52  ;;  %v4537_v52 = vpack.c.bf16 %v1808_v48, %v1807_v45 }
  0x5a   : > { %p5117_p0 = pneg %p5116_p13 }
  0x5b   : > { %4538 = vmatprep.subr.bf16.mxu0 %v4537_v52 }
  0x5c   : > { %4248 = vmatmul.mubr.msk.f32.gmra.mrb[20].mxu0 %vm506_vm0, %v451_v51  ;;  %4311 = vmatmul.mubr.msk.f32.gmra.mrb[20].mxu1 %vm506_vm0, %v493_v54  ;;  %v2805_v51 = vld [vmem:[%s5265_s14 + $0x48] sm:$0xff]  ;;  %p5124_p4 = pnand %p5123_p3, %p5117_p0 }
  0x5d   : > { %4250 = vmatprep.mubr.msk.f32.mxu0 %vm506_vm0, %v452_v53  ;;  %2888 = vperm.xlu0 %4642, %v2805_v51  }
  0x5e   : > { %4540 = vmatpush3.bf16.msra.mxu0 %v4537_v52 }
  0x60   : > { %4251 = vmatmul.mubr.msk.f32.gmra.mrb[22].mxu0 %vm506_vm0, %v453_v55  ;;  %v2799_v55 = vld [vmem:[%s5265_s14 + $0x18] sm:$0xff] }
  0x61   : > { %4253 = vmatprep.mubr.msk.f32.mxu0 %vm506_vm0, %v454_v56  ;;  %2870 = vperm.xlu1 %4643, %v2799_v55  }
  0x64   : > { %4254 = vmatmul.mubr.msk.f32.gmra.mrb[24].mxu0 %vm506_vm0, %v455_v57 }
  0x65   : > { %4256 = vmatprep.mubr.msk.f32.mxu0 %vm506_vm0, %v456_v58 }
  0x68   : > { %4257 = vmatmul.mubr.msk.f32.gmra.mrb[26].mxu0 %vm506_vm0, %v457_v59 }
  0x69   : > { %4259 = vmatprep.mubr.msk.f32.mxu0 %vm506_vm0, %v458_v60 }
  0x6c   : > { %4260 = vmatmul.mubr.msk.f32.gmra.mrb[28].mxu0 %vm506_vm0, %v459_v61 }
  0x6d   : > { %4262 = vmatprep.mubr.msk.f32.mxu0 %vm506_vm0, %v460_v62  ;;  %v2812_v62 = vld [vmem:[%s5265_s14 + $0x80] sm:$0xff] }
  0x6e   : > { %2909 = vperm.xlu0 %4642, %v2812_v62   ;;  %v2806_v62 = vld [vmem:[%s5265_s14 + $0x50] sm:$0xff] }
  0x70   : > { %4263 = vmatmul.mubr.msk.f32.gmra.mrb[30].mxu0 %vm506_vm0, %v461_v63 }
  0x71   : > { %4265 = vmatprep.mubr.msk.f32.mxu0 %vm506_vm0, %v462_v0 }
  0x74   : > { %4266 = vmatmul.mubr.msk.f32.gmra.mrb[32].mxu0 %vm506_vm0, %v463_v1  ;;  %v2800_v1 = vld [vmem:[%s5265_s14 + $0x20] sm:$0xff] }
  0x75   : > { %4268 = vmatprep.mubr.msk.f32.mxu0 %vm506_vm0, %v464_v2  ;;  %2873 = vperm.xlu1 %4643, %v2800_v1  }
  0x78   : > { %4269 = vmatmul.mubr.msk.f32.gmra.mrb[34].mxu0 %vm506_vm0, %v465_v3 }
  0x79   : > { %4271 = vmatprep.mubr.msk.f32.mxu0 %vm506_vm0, %v466_v4 }
  0x7c   : > { %4272 = vmatmul.mubr.msk.f32.gmra.mrb[36].mxu0 %vm506_vm0, %v467_v5 }
  0x7d   : > { %4274 = vmatprep.mubr.msk.f32.mxu0 %vm506_vm0, %v468_v6 }
  0x80   : > { %4275 = vmatmul.mubr.msk.f32.gmra.mrb[38].mxu0 %vm506_vm0, %v469_v7 }
  0x81   : > { %4277 = vmatprep.mubr.msk.f32.mxu0 %vm506_vm0, %v470_v8  ;;  %v2814_v8 = vld [vmem:[%s5265_s14 + $0x90] sm:$0xff] }
  0x82   : > { %2915 = vperm.xlu0 %4642, %v2814_v8  }
  0x84   : > { %4278 = vmatmul.mubr.msk.f32.gmra.mrb[40].mxu0 %vm506_vm0, %v471_v9 }
 0x107   : > { %v4219_v11 = vpop.f32.mrb[0].mxu0  ;;  %v5415_v15 = vpop.f32.mrb[0].mxu1 }
 0x108   : > { %v771_v12 = vadd.f32 %v4219_v11, %v5411_v10  ;;  %v765_v13 = vpop.f32.mrb[1].mxu0  ;;  %v5417_v17 = vpop.f32.mrb[1].mxu1 }
 0x109   : > { %v766_v14 = vadd.f32 %v5411_v10, %v765_v13 }
 0x10b   : > { %4718 = vtanh.f32 %v766_v14  ;;  %v4222_v16 = vpop.f32.mrb[2].mxu0  ;;  %v5421_v21 = vpop.f32.mrb[2].mxu1 }
 0x10c   : > { %4720 = vtanh.f32 %v771_v12  ;;  %v781_v18 = vadd.f32 %v4222_v16, %v5411_v10  ;;  %v775_v19 = vpop.f32.mrb[3].mxu0  ;;  %v5423_v23 = vpop.f32.mrb[3].mxu1  ;;  %v2801_v12 = vld [vmem:[%s5265_s14 + $0x28] sm:$0xff] }
 0x10d   : > { %v776_v20 = vadd.f32 %v5411_v10, %v775_v19  ;;  %2876 = vperm.xlu1 %4643, %v2801_v12  }
 0x10f   : > { %4722 = vtanh.f32 %v776_v20  ;;  %v4225_v22 = vpop.f32.mrb[4].mxu0  ;;  %v5427_v27 = vpop.f32.mrb[4].mxu1 }
 0x110   : > { %4724 = vtanh.f32 %v781_v18  ;;  %v791_v24 = vadd.f32 %v4225_v22, %v5411_v10  ;;  %v785_v25 = vpop.f32.mrb[5].mxu0  ;;  %v5429_v29 = vpop.f32.mrb[5].mxu1  ;;  %v2816_v22 = vld [vmem:[%s5265_s14 + $0xa0] sm:$0xff] }
 0x111   : > { %v786_v26 = vadd.f32 %v5411_v10, %v785_v25  ;;  %2921 = vperm.xlu0 %4642, %v2816_v22   ;;  %v2815_v22 = vld [vmem:[%s5265_s14 + $0x98] sm:$0xff] }
 0x113   : > { %4726 = vtanh.f32 %v786_v26  ;;  %v4228_v28 = vpop.f32.mrb[6].mxu0  ;;  %v5440_v40 = vpop.f32.mrb[6].mxu1  ;;  %v2802_v26 = vld [vmem:[%s5265_s14 + $0x30] sm:$0xff] }
 0x114   : > { %4728 = vtanh.f32 %v791_v24  ;;  %v801_v31 = vadd.f32 %v4228_v28, %v5411_v10  ;;  %v795_v32 = vpop.f32.mrb[7].mxu0  ;;  %v5445_v44 = vpop.f32.mrb[7].mxu1  ;;  %2879 = vperm.xlu1 %4643, %v2802_v26  }
 0x115   : > { %v4719_v36 = vpop.eup %4718  ;;  %v796_v37 = vadd.f32 %v5411_v10, %v795_v32  ;;  %2927 = vperm.xlu0 %4642, %v2818_v35  }
 0x116   : > { %v4721_v39 = vpop.eup %4720  ;;  %4321 = vmatprep.mubr.msk.f32.mxu1 %vm1162_vm1, %v4719_v36 }
 0x117   : > { %4730 = vtanh.f32 %v796_v37  ;;  %v4231_v43 = vpop.f32.mrb[8].mxu0  ;;  %4322 = vmatmul.mubr.msk.f32.vlgmr.msra.gmra.mrb[22].mxu1 %vm1162_vm1, %v4721_v39  ;;  %v5451_v54 = vpop.f32.mrb[8].mxu1 }
 0x118   : > { %4732 = vtanh.f32 %v801_v31  ;;  %v811_v46 = vadd.f32 %v4231_v43, %v5411_v10  ;;  %v805_v47 = vpop.f32.mrb[9].mxu0  ;;  %v5455_v57 = vpop.f32.mrb[9].mxu1  ;;  %2882 = vperm.xlu1 %4643, %v2803_v38  }
 0x119   : > { %v4723_v49 = vpop.eup %4722  ;;  %v806_v50 = vadd.f32 %v5411_v10, %v805_v47  ;;  %v2820_v47 = vld [vmem:[%s5265_s14 + $0xc0] sm:$0xff] }
 0x11a   : > { %v4725_v53 = vpop.eup %4724  ;;  %4324 = vmatprep.mubr.msk.f32.mxu1 %vm1162_vm1, %v4723_v49  ;;  %2933 = vperm.xlu0 %4642, %v2820_v47  }
 0x11b   : > { %4734 = vtanh.f32 %v806_v50  ;;  %v4234_v56 = vpop.f32.mrb[10].mxu0  ;;  %4325 = vmatmul.mubr.msk.f32.gmra.mrb[24].mxu1 %vm1162_vm1, %v4725_v53  ;;  %v5461_v0 = vpop.f32.mrb[10].mxu1  ;;  %v2804_v50 = vld [vmem:[%s5265_s14 + $0x40] sm:$0xff] }
 0x11c   : > { %4736 = vtanh.f32 %v811_v46  ;;  %v821_v58 = vadd.f32 %v4234_v56, %v5411_v10  ;;  %v815_v59 = vpop.f32.mrb[11].mxu0  ;;  %v5465_v3 = vpop.f32.mrb[11].mxu1  ;;  %2885 = vperm.xlu1 %4643, %v2804_v50  }
 0x11d   : > { %v4727_v60 = vpop.eup %4726  ;;  %v816_v61 = vadd.f32 %v5411_v10, %v815_v59  ;;  %v2822_v59 = vld [vmem:[%s5265_s14 + $0xd0] sm:$0xff] }
 0x11e   : > { %v4729_v63 = vpop.eup %4728  ;;  %4327 = vmatprep.mubr.msk.f32.mxu1 %vm1162_vm1, %v4727_v60  ;;  %2939 = vperm.xlu0 %4642, %v2822_v59  }
 0x11f   : > { %4738 = vtanh.f32 %v816_v61  ;;  %v4237_v2 = vpop.f32.mrb[12].mxu0  ;;  %4328 = vmatmul.mubr.msk.f32.gmra.mrb[26].mxu1 %vm1162_vm1, %v4729_v63  ;;  %v5471_v11 = vpop.f32.mrb[12].mxu1 }
 0x120   : > { %4740 = vtanh.f32 %v821_v58  ;;  %v831_v4 = vadd.f32 %v4237_v2, %v5411_v10  ;;  %v825_v5 = vpop.f32.mrb[13].mxu0  ;;  %v5475_v14 = vpop.f32.mrb[13].mxu1  ;;  %2891 = vperm.xlu1 %4643, %v2806_v62  }
 0x121   : > { %v4731_v6 = vpop.eup %4730  ;;  %v826_v7 = vadd.f32 %v5411_v10, %v825_v5 }
 0x122   : > { %v4733_v9 = vpop.eup %4732  ;;  %4330 = vmatprep.mubr.msk.f32.mxu1 %vm1162_vm1, %v4731_v6 }
 0x123   : > { %4742 = vtanh.f32 %v826_v7  ;;  %v4240_v13 = vpop.f32.mrb[14].mxu0  ;;  %4331 = vmatmul.mubr.msk.f32.gmra.mrb[28].mxu1 %vm1162_vm1, %v4733_v9  ;;  %v5481_v25 = vpop.f32.mrb[14].mxu1  ;;  %v2807_v7 = vld [vmem:[%s5265_s14 + $0x58] sm:$0xff]  ;;  %v2813_v9 = vld [vmem:[%s5265_s14 + $0x88] sm:$0xff] }
 0x124   : > { %4744 = vtanh.f32 %v831_v4  ;;  %v841_v16 = vadd.f32 %v4240_v13, %v5411_v10  ;;  %v835_v18 = vpop.f32.mrb[15].mxu0  ;;  %v5485_v30 = vpop.f32.mrb[15].mxu1  ;;  %2894 = vperm.xlu0 %4642, %v2807_v7   ;;  %2912 = vperm.xlu1 %4643, %v2813_v9  }
 0x125   : > { %v4735_v19 = vpop.eup %4734  ;;  %v836_v20 = vadd.f32 %v5411_v10, %v835_v18 }
 0x126   : > { %v4737_v24 = vpop.eup %4736  ;;  %4333 = vmatprep.mubr.msk.f32.mxu1 %vm1162_vm1, %v4735_v19 }
 0x127   : > { %4746 = vtanh.f32 %v836_v20  ;;  %v4243_v28 = vpop.f32.mrb[16].mxu0  ;;  %4334 = vmatmul.mubr.msk.f32.gmra.mrb[30].mxu1 %vm1162_vm1, %v4737_v24  ;;  %v5491_v37 = vpop.f32.mrb[16].mxu1 }
 0x128   : > { %4748 = vtanh.f32 %v841_v16  ;;  %v851_v31 = vadd.f32 %v4243_v28, %v5411_v10  ;;  %v845_v32 = vpop.f32.mrb[17].mxu0  ;;  %v5495_v41 = vpop.f32.mrb[17].mxu1  ;;  %2918 = vperm.xlu1 %4643, %v2815_v22  }
 0x129   : > { %v4739_v33 = vpop.eup %4738  ;;  %v846_v34 = vadd.f32 %v5411_v10, %v845_v32 }
 0x12a   : > { %v4741_v36 = vpop.eup %4740  ;;  %4336 = vmatprep.mubr.msk.f32.mxu1 %vm1162_vm1, %v4739_v33 }
 0x12b   : > { %4750 = vtanh.f32 %v846_v34  ;;  %v4246_v39 = vpop.f32.mrb[18].mxu0  ;;  %4337 = vmatmul.mubr.msk.f32.gmra.mrb[32].mxu1 %vm1162_vm1, %v4741_v36  ;;  %v5501_v49 = vpop.f32.mrb[18].mxu1  ;;  %v2817_v34 = vld [vmem:[%s5265_s14 + $0xa8] sm:$0xff] }
 0x12c   : > { %4752 = vtanh.f32 %v851_v31  ;;  %v861_v42 = vadd.f32 %v4246_v39, %v5411_v10  ;;  %v855_v43 = vpop.f32.mrb[19].mxu0  ;;  %v5505_v52 = vpop.f32.mrb[19].mxu1  ;;  %2924 = vperm.xlu1 %4643, %v2817_v34  }
 0x12d   : > { %v4743_v45 = vpop.eup %4742  ;;  %v856_v46 = vadd.f32 %v5411_v10, %v855_v43 }
 0x12e   : > { %v4745_v48 = vpop.eup %4744  ;;  %4339 = vmatprep.mubr.msk.f32.mxu1 %vm1162_vm1, %v4743_v45  ;;  %v2819_v45 = vld [vmem:[%s5265_s14 + $0xb8] sm:$0xff] }
 0x12f   : > { %4754 = vtanh.f32 %v856_v46  ;;  %v4249_v51 = vpop.f32.mrb[20].mxu0  ;;  %4340 = vmatmul.mubr.msk.f32.gmra.mrb[34].mxu1 %vm1162_vm1, %v4745_v48  ;;  %v5511_v61 = vpop.f32.mrb[20].mxu1 }
 0x130   : > { %4756 = vtanh.f32 %v861_v42  ;;  %v871_v53 = vadd.f32 %v4249_v51, %v5411_v10  ;;  %v865_v55 = vpop.f32.mrb[21].mxu0  ;;  %v5515_v1 = vpop.f32.mrb[21].mxu1  ;;  %2930 = vperm.xlu1 %4643, %v2819_v45  }
 0x131   : > { %v4747_v56 = vpop.eup %4746  ;;  %v866_v58 = vadd.f32 %v5411_v10, %v865_v55  ;;  %v2821_v55 = vld [vmem:[%s5265_s14 + $0xc8] sm:$0xff] }
 0x132   : > { %v4749_v60 = vpop.eup %4748  ;;  %4342 = vmatprep.mubr.msk.f32.mxu1 %vm1162_vm1, %v4747_v56 }
 0x133   : > { %4758 = vtanh.f32 %v866_v58  ;;  %v4252_v63 = vpop.f32.mrb[22].mxu0  ;;  %4343 = vmatmul.mubr.msk.f32.gmra.mrb[36].mxu1 %vm1162_vm1, %v4749_v60 }
 0x134   : > { %4760 = vtanh.f32 %v871_v53  ;;  %v881_v2 = vadd.f32 %v4252_v63, %v5411_v10  ;;  %v875_v4 = vpop.f32.mrb[23].mxu0  ;;  %2936 = vperm.xlu1 %4643, %v2821_v55  }
 0x135   : > { %v4751_v5 = vpop.eup %4750  ;;  %v876_v6 = vadd.f32 %v5411_v10, %v875_v4 }
 0x136   : > { %v4753_v8 = vpop.eup %4752  ;;  %4345 = vmatprep.mubr.msk.f32.mxu1 %vm1162_vm1, %v4751_v5 }
 0x137   : > { %4762 = vtanh.f32 %v876_v6  ;;  %v4255_v12 = vpop.f32.mrb[24].mxu0  ;;  %4346 = vmatmul.mubr.msk.f32.gmra.mrb[38].mxu1 %vm1162_vm1, %v4753_v8 }
 0x138   : > { %4764 = vtanh.f32 %v881_v2  ;;  %v891_v13 = vadd.f32 %v4255_v12, %v5411_v10  ;;  %v885_v16 = vpop.f32.mrb[25].mxu0  ;;  %v2823_v2 = vld [vmem:[%s5265_s14 + $0xd8] sm:$0xff] }
 0x139   : > { %v4755_v18 = vpop.eup %4754  ;;  %v886_v19 = vadd.f32 %v5411_v10, %v885_v16  ;;  %2942 = vperm.xlu1 %4643, %v2823_v2   ;;  %v2809_v2 = vld [vmem:[%s5265_s14 + $0x68] sm:$0xff] }
 0x13a   : > { %v4757_v20 = vpop.eup %4756  ;;  %4348 = vmatprep.mubr.msk.f32.mxu1 %vm1162_vm1, %v4755_v18 }
 0x13b   : > { %4766 = vtanh.f32 %v886_v19  ;;  %v4258_v24 = vpop.f32.mrb[26].mxu0  ;;  %4349 = vmatmul.mubr.msk.f32.gmra.mrb[40].mxu1 %vm1162_vm1, %v4757_v20 }
 0x13c   : > { %4768 = vtanh.f32 %v891_v13  ;;  %v901_v26 = vadd.f32 %v4258_v24, %v5411_v10  ;;  %v895_v28 = vpop.f32.mrb[27].mxu0 }
 0x13d   : > { %v4759_v31 = vpop.eup %4758  ;;  %v896_v32 = vadd.f32 %v5411_v10, %v895_v28 }
 0x13e   : > { %v4761_v33 = vpop.eup %4760  ;;  %4351 = vmatprep.mubr.msk.f32.mxu1 %vm1162_vm1, %v4759_v31 }
 0x13f   : > { %4770 = vtanh.f32 %v896_v32  ;;  %v4261_v35 = vpop.f32.mrb[28].mxu0  ;;  %4352 = vmatmul.mubr.msk.f32.gmra.mrb[42].mxu1 %vm1162_vm1, %v4761_v33  ;;  %v976_v33 = vadd.f32 %v5411_v10, %v5417_v17  ;;  %v986_v17 = vadd.f32 %v5411_v10, %v5423_v23 }
 0x140   : > { %4772 = vtanh.f32 %v901_v26  ;;  %v911_v36 = vadd.f32 %v4261_v35, %v5411_v10  ;;  %v905_v38 = vpop.f32.mrb[29].mxu0 }
 0x141   : > { %v4763_v39 = vpop.eup %4762  ;;  %v906_v42 = vadd.f32 %v5411_v10, %v905_v38 }
 0x142   : > { %v4765_v43 = vpop.eup %4764  ;;  %4354 = vmatprep.mubr.msk.f32.mxu1 %vm1162_vm1, %v4763_v39 }
 0x143   : > { %4774 = vtanh.f32 %v906_v42  ;;  %v4264_v46 = vpop.f32.mrb[30].mxu0  ;;  %4355 = vmatmul.mubr.msk.f32.gmra.mrb[44].mxu1 %vm1162_vm1, %v4765_v43  ;;  %v981_v43 = vadd.f32 %v5415_v15, %v5411_v10  ;;  %v1006_v15 = vadd.f32 %v5411_v10, %v5445_v44  ;;  %v1011_v44 = vadd.f32 %v5440_v40, %v5411_v10 }
 0x144   : > { %4776 = vtanh.f32 %v911_v36  ;;  %v921_v47 = vadd.f32 %v4264_v46, %v5411_v10  ;;  %v915_v48 = vpop.f32.mrb[31].mxu0 }
 0x145   : > { %v4767_v50 = vpop.eup %4766  ;;  %v916_v51 = vadd.f32 %v5411_v10, %v915_v48  ;;  %v991_v48 = vadd.f32 %v5421_v21, %v5411_v10  ;;  %v1016_v21 = vadd.f32 %v5411_v10, %v5455_v57  ;;  %v1026_v57 = vadd.f32 %v5411_v10, %v5465_v3 }
 0x146   : > { %v4769_v53 = vpop.eup %4768  ;;  %4357 = vmatprep.mubr.msk.f32.mxu1 %vm1162_vm1, %v4767_v50  ;;  %v1036_v3 = vadd.f32 %v5411_v10, %v5475_v14  ;;  %v1046_v14 = vadd.f32 %v5411_v10, %v5485_v30  ;;  %v1056_v30 = vadd.f32 %v5411_v10, %v5495_v41  ;;  %v1066_v41 = vadd.f32 %v5411_v10, %v5505_v52 }
 0x147   : > { %4778 = vtanh.f32 %v916_v51  ;;  %v4267_v56 = vpop.f32.mrb[32].mxu0  ;;  %4358 = vmatmul.mubr.msk.f32.gmra.mrb[46].mxu1 %vm1162_vm1, %v4769_v53  ;;  %v1076_v52 = vadd.f32 %v5411_v10, %v5515_v1 }
 0x148   : > { %4780 = vtanh.f32 %v921_v47  ;;  %v931_v58 = vadd.f32 %v4267_v56, %v5411_v10  ;;  %v925_v59 = vpop.f32.mrb[33].mxu0  ;;  %v996_v47 = vadd.f32 %v5411_v10, %v5429_v29  ;;  %v1001_v29 = vadd.f32 %v5427_v27, %v5411_v10 }
 0x149   : > { %v4771_v60 = vpop.eup %4770  ;;  %v926_v62 = vadd.f32 %v5411_v10, %v925_v59  ;;  %v1021_v27 = vadd.f32 %v5451_v54, %v5411_v10  ;;  %v2824_v59 = vld [vmem:[%s5265_s14 + $0xe0] sm:$0xff]  ;;  %v1031_v54 = vadd.f32 %v5461_v0, %v5411_v10  ;;  %v1041_v0 = vadd.f32 %v5471_v11, %v5411_v10 }
 0x14a   : > { %v4773_v63 = vpop.eup %4772  ;;  %4360 = vmatprep.mubr.msk.f32.mxu1 %vm1162_vm1, %v4771_v60  ;;  %v2825_v60 = vld [vmem:[%s5265_s14 + $0xe8] sm:$0xff]  ;;  %2945 = vperm.xlu1 %4643, %v2824_v59   ;;  %v1051_v11 = vadd.f32 %v5481_v25, %v5411_v10  ;;  %v1061_v25 = vadd.f32 %v5491_v37, %v5411_v10  ;;  %v1071_v37 = vadd.f32 %v5501_v49, %v5411_v10 }
 0x14b   : > { %4782 = vtanh.f32 %v926_v62  ;;  %v4270_v4 = vpop.f32.mrb[34].mxu0  ;;  %4361 = vmatmul.mubr.msk.f32.gmra.mrb[48].mxu1 %vm1162_vm1, %v4773_v63  ;;  %2948 = vperm.xlu0 %4642, %v2825_v60   ;;  %v2808_v63 = vld [vmem:[%s5265_s14 + $0x60] sm:$0xff]  ;;  %v1081_v49 = vadd.f32 %v5511_v61, %v5411_v10  ;;  %v2857_v59 = vld [vmem:[%s5265_s14 + $0x1e8] sm:$0xff]  ;;  %v5670_v60 = vpop.permute.xlu1 %2864 }
 0x14c   : > { %4784 = vtanh.f32 %v931_v58  ;;  %v941_v5 = vadd.f32 %v4270_v4, %v5411_v10  ;;  %v935_v6 = vpop.f32.mrb[35].mxu0 }
 0x14d   : > { %v4775_v7 = vpop.eup %4774  ;;  %v936_v8 = vadd.f32 %v5411_v10, %v935_v6  ;;  %v2826_v6 = vld [vmem:[%s5265_s14 + $0xf0] sm:$0xff] }
 0x14e   : > { %v4777_v9 = vpop.eup %4776  ;;  %4363 = vmatprep.mubr.msk.f32.mxu1 %vm1162_vm1, %v4775_v7  ;;  %2897 = vperm.xlu1 %4643, %v2808_v63   ;;  %v2827_v7 = vld [vmem:[%s5265_s14 + $0xf8] sm:$0xff] }
 0x14f   : > { %4786 = vtanh.f32 %v936_v8  ;;  %v4273_v12 = vpop.f32.mrb[36].mxu0  ;;  %4364 = vmatmul.mubr.msk.f32.gmra.mrb[50].mxu1 %vm1162_vm1, %v4777_v9  ;;  %2900 = vperm.xlu0 %4642, %v2809_v2   ;;  %v2859_v63 = vld [vmem:[%s5265_s14 + $0x1f8] sm:$0xff] }
 0x150   : > { %4788 = vtanh.f32 %v941_v5  ;;  %v951_v13 = vadd.f32 %v4273_v12, %v5411_v10  ;;  %v945_v16 = vpop.f32.mrb[37].mxu0  ;;  %v2810_v12 = vld [vmem:[%s5265_s14 + $0x70] sm:$0xff] }
 0x151   : > { %v4779_v18 = vpop.eup %4778  ;;  %v946_v19 = vadd.f32 %v5411_v10, %v945_v16 }
 0x152   : > { %v4781_v20 = vpop.eup %4780  ;;  %4366 = vmatprep.mubr.msk.f32.mxu1 %vm1162_vm1, %v4779_v18  ;;  %2951 = vperm.xlu1 %4643, %v2826_v6  }
 0x153   : > { %4790 = vtanh.f32 %v946_v19  ;;  %v4276_v22 = vpop.f32.mrb[38].mxu0  ;;  %4367 = vmatmul.mubr.msk.f32.gmra.mrb[52].mxu1 %vm1162_vm1, %v4781_v20  ;;  %2954 = vperm.xlu0 %4642, %v2827_v7   ;;  %v2844_v19 = vld [vmem:[%s5265_s14 + $0x180] sm:$0xff]  ;;  %v2845_v20 = vld [vmem:[%s5265_s14 + $0x188] sm:$0xff] }
 0x154   : > { %4792 = vtanh.f32 %v951_v13  ;;  %v961_v24 = vadd.f32 %v4276_v22, %v5411_v10  ;;  %v955_v26 = vpop.f32.mrb[39].mxu0  ;;  %v2811_v13 = vld [vmem:[%s5265_s14 + $0x78] sm:$0xff] }
 0x155   : > { %v4783_v28 = vpop.eup %4782  ;;  %v956_v31 = vadd.f32 %v5411_v10, %v955_v26  ;;  %v2828_v26 = vld [vmem:[%s5265_s14 + $0x100] sm:$0xff] }
 0x156   : > { %v4785_v32 = vpop.eup %4784  ;;  %4369 = vmatprep.mubr.msk.f32.mxu1 %vm1162_vm1, %v4783_v28  ;;  %2903 = vperm.xlu1 %4643, %v2810_v12   ;;  %v2829_v28 = vld [vmem:[%s5265_s14 + $0x108] sm:$0xff] }
 0x157   : > { %4794 = vtanh.f32 %v956_v31  ;;  %v4279_v34 = vpop.f32.mrb[40].mxu0  ;;  %4370 = vmatmul.mubr.msk.f32.gmra.mrb[54].mxu1 %vm1162_vm1, %v4785_v32  ;;  %2906 = vperm.xlu0 %4642, %v2811_v13  }
 0x158   : > { %4796 = vtanh.f32 %v961_v24  ;;  %v971_v35 = vadd.f32 %v4279_v34, %v5411_v10  ;;  %v965_v36 = vpop.f32.mrb[41].mxu0  ;;  %v2847_v34 = vld [vmem:[%s5265_s14 + $0x198] sm:$0xff] }
 0x159   : > { %v4787_v38 = vpop.eup %4786  ;;  %v966_v39 = vadd.f32 %v5411_v10, %v965_v36  ;;  %4798 = vtanh.f32 %v976_v33  ;;  %v2846_v33 = vld [vmem:[%s5265_s14 + $0x190] sm:$0xff] }
 0x15a   : > { %v4789_v42 = vpop.eup %4788  ;;  %4372 = vmatprep.mubr.msk.f32.mxu1 %vm1162_vm1, %v4787_v38  ;;  %3005 = vperm.xlu1 %4643, %v2844_v19   ;;  %v2830_v36 = vld [vmem:[%s5265_s14 + $0x110] sm:$0xff]  ;;  %v2831_v38 = vld [vmem:[%s5265_s14 + $0x118] sm:$0xff] }
 0x15b   : > { %4800 = vtanh.f32 %v966_v39  ;;  %4373 = vmatmul.mubr.msk.f32.gmra.mrb[56].mxu1 %vm1162_vm1, %v4789_v42  ;;  %3008 = vperm.xlu0 %4642, %v2845_v20   ;;  %v2848_v39 = vld [vmem:[%s5265_s14 + $0x1a0] sm:$0xff]  ;;  %v2849_v42 = vld [vmem:[%s5265_s14 + $0x1a8] sm:$0xff] }
 0x15c   : > { %4802 = vtanh.f32 %v971_v35 }
 0x15d   : > { %v4791_v45 = vpop.eup %4790  ;;  %4804 = vtanh.f32 %v986_v17 }
 0x15e   : > { %v4793_v46 = vpop.eup %4792  ;;  %4375 = vmatprep.mubr.msk.f32.mxu1 %vm1162_vm1, %v4791_v45  ;;  %4806 = vtanh.f32 %v981_v43  ;;  %2957 = vperm.xlu1 %4643, %v2828_v26   ;;  %v2832_v45 = vld [vmem:[%s5265_s14 + $0x120] sm:$0xff] }
 0x15f   : > { %4376 = vmatmul.mubr.msk.f32.gmra.mrb[58].mxu1 %vm1162_vm1, %v4793_v46  ;;  %4808 = vtanh.f32 %v996_v47  ;;  %2960 = vperm.xlu0 %4642, %v2829_v28   ;;  %v2833_v46 = vld [vmem:[%s5265_s14 + $0x128] sm:$0xff]  ;;  %v5718_v28 = vld [vmem:[%s1154_s17] ss:$0 sm:$0xff] }
 0x160   : > { %4810 = vtanh.f32 %v991_v48  ;;  %v2850_v48 = vld [vmem:[%s5265_s14 + $0x1b0] sm:$0xff] }
 0x161   : > { %v4795_v50 = vpop.eup %4794  ;;  %4812 = vtanh.f32 %v1006_v15  ;;  %v2835_v15 = vld [vmem:[%s5265_s14 + $0x138] sm:$0xff] }
 0x162   : > { %v4797_v23 = vpop.eup %4796  ;;  %4378 = vmatprep.mubr.msk.f32.mxu1 %vm1162_vm1, %v4795_v50  ;;  %4814 = vtanh.f32 %v1001_v29  ;;  %3011 = vperm.xlu1 %4643, %v2846_v33   ;;  %v2851_v50 = vld [vmem:[%s5265_s14 + $0x1b8] sm:$0xff]  ;;  %v2853_v29 = vld [vmem:[%s5265_s14 + $0x1c8] sm:$0xff] }
 0x163   : > { %4379 = vmatmul.mubr.msk.f32.gmra.mrb[60].mxu1 %vm1162_vm1, %v4797_v23  ;;  %v4799_v51 = vpop.eup %4798  ;;  %4816 = vtanh.f32 %v1016_v21  ;;  %3014 = vperm.xlu0 %4642, %v2847_v34   ;;  %v2834_v23 = vld [vmem:[%s5265_s14 + $0x130] sm:$0xff] }
 0x164   : > { %4818 = vtanh.f32 %v1011_v44  ;;  %v2854_v21 = vld [vmem:[%s5265_s14 + $0x1d0] sm:$0xff]  ;;  %v2855_v44 = vld [vmem:[%s5265_s14 + $0x1d8] sm:$0xff] }
 0x165   : > { %v4801_v53 = vpop.eup %4800  ;;  %4820 = vtanh.f32 %v1021_v27  ;;  %v2856_v27 = vld [vmem:[%s5265_s14 + $0x1e0] sm:$0xff] }
 0x166   : > { %v4803_v55 = vpop.eup %4802  ;;  %4381 = vmatprep.mubr.msk.f32.mxu1 %vm1162_vm1, %v4801_v53  ;;  %4822 = vtanh.f32 %v1026_v57  ;;  %2963 = vperm.xlu1 %4643, %v2830_v36   ;;  %v2836_v53 = vld [vmem:[%s5265_s14 + $0x140] sm:$0xff] }
 0x167   : > { %4382 = vmatmul.mubr.msk.f32.gmra.mrb[62].mxu1 %vm1162_vm1, %v4803_v55  ;;  %v4805_v56 = vpop.eup %4804  ;;  %4824 = vtanh.f32 %v1031_v54  ;;  %2966 = vperm.xlu0 %4642, %v2831_v38   ;;  %v2837_v55 = vld [vmem:[%s5265_s14 + $0x148] sm:$0xff]  ;;  %v2840_v57 = vld [vmem:[%s5265_s14 + $0x160] sm:$0xff]  ;;  %v2858_v54 = vld [vmem:[%s5265_s14 + $0x1f0] sm:$0xff] }
 0x168   : > { %4384 = vmatprep.mubr.msk.f32.mxu1 %vm1162_vm1, %v4799_v51  ;;  %v4807_v58 = vpop.eup %4806  ;;  %4826 = vtanh.f32 %v1036_v3  ;;  %v2852_v51 = vld [vmem:[%s5265_s14 + $0x1c0] sm:$0xff]  ;;  %v2842_v3 = vld [vmem:[%s5265_s14 + $0x170] sm:$0xff] }
 0x169   : > { %v4809_v40 = vpop.eup %4808  ;;  %4828 = vtanh.f32 %v1041_v0 }
 0x16a   : > { %v4811_v62 = vpop.eup %4810  ;;  %4830 = vtanh.f32 %v1046_v14  ;;  %3017 = vperm.xlu1 %4643, %v2848_v39   ;;  %v2862_v14 = vpop.permute.xlu0 %2861 }
 0x16b   : > { %4385 = vmatmul.mubr.msk.f32.gmra.mrb[64].mxu1 %vm1162_vm1, %v4807_v58  ;;  %v4813_v4 = vpop.eup %4812  ;;  %4832 = vtanh.f32 %v1051_v11  ;;  %3020 = vperm.xlu0 %4642, %v2849_v42   ;;  %v2839_v58 = vld [vmem:[%s5265_s14 + $0x158] sm:$0xff] }
 0x16c   : > { %4387 = vmatprep.mubr.msk.f32.mxu1 %vm1162_vm1, %v4805_v56  ;;  %v4815_v5 = vpop.eup %4814  ;;  %4834 = vtanh.f32 %v1056_v30  ;;  %v2838_v56 = vld [vmem:[%s5265_s14 + $0x150] sm:$0xff] }
 0x16d   : > { %v4817_v8 = vpop.eup %4816  ;;  %4836 = vtanh.f32 %v1061_v25 }
 0x16e   : > { %v4819_v9 = vpop.eup %4818  ;;  %4838 = vtanh.f32 %v1066_v41  ;;  %2969 = vperm.xlu1 %4643, %v2832_v45  }
 0x16f   : > { %4388 = vmatmul.mubr.msk.f32.gmra.mrb[66].mxu1 %vm1162_vm1, %v4811_v62  ;;  %v4821_v16 = vpop.eup %4820  ;;  %4840 = vtanh.f32 %v1071_v37  ;;  %2972 = vperm.xlu0 %4642, %v2833_v46   ;;  %v5674_v62 = vpop.permute.xlu1 %2867 }
 0x170   : > { %4390 = vmatprep.mubr.msk.f32.mxu1 %vm1162_vm1, %v4809_v40  ;;  %v4823_v18 = vpop.eup %4822  ;;  %4842 = vtanh.f32 %v1076_v52  ;;  %v2841_v40 = vld [vmem:[%s5265_s14 + $0x168] sm:$0xff]  ;;  %v2794_v52 = vlaneseq }
 0x171   : > { %v4825_v22 = vpop.eup %4824  ;;  %4844 = vtanh.f32 %v1081_v49 }
 0x172   : > { %v4827_v24 = vpop.eup %4826  ;;  %3023 = vperm.xlu1 %4643, %v2850_v48  }
 0x173   : > { %4391 = vmatmul.mubr.msk.f32.gmra.mrb[68].mxu1 %vm1162_vm1, %v4815_v5  ;;  %v4829_v31 = vpop.eup %4828  ;;  %3026 = vperm.xlu0 %4642, %v2851_v50   ;;  %v5678_v2 = vpop.permute.xlu1 %2870 }
 0x174   : > { %4393 = vmatprep.mubr.msk.f32.mxu1 %vm1162_vm1, %v4813_v4  ;;  %v4831_v32 = vpop.eup %4830  ;;  %v2843_v4 = vld [vmem:[%s5265_s14 + $0x178] sm:$0xff] }
 0x175   : > { %v4833_v1 = vpop.eup %4832 }
 0x176   : > { %v4835_v35 = vpop.eup %4834  ;;  %2975 = vperm.xlu1 %4643, %v2834_v23  }
 0x177   : > { %4394 = vmatmul.mubr.msk.f32.gmra.mrb[70].mxu1 %vm1162_vm1, %v4819_v9  ;;  %v4837_v10 = vpop.eup %4836  ;;  %2978 = vperm.xlu0 %4642, %v2835_v15   ;;  %v5682_v5 = vpop.permute.xlu1 %2873 }
 0x178   : > { %4396 = vmatprep.mubr.msk.f32.mxu1 %vm1162_vm1, %v4817_v8  ;;  %v4839_v61 = vpop.eup %4838  ;;  %v5692_v9 = vpop.permute.xlu0 %2888 }
 0x179   : > { %v4841_v17 = vpop.eup %4840 }
 0x17a   : > { %v4843_v43 = vpop.eup %4842  ;;  %3029 = vperm.xlu1 %4643, %v2852_v51  }
 0x17b   : > { %4397 = vmatmul.mubr.msk.f32.gmra.mrb[72].mxu1 %vm1162_vm1, %v4821_v16  ;;  %v4845_v47 = vpop.eup %4844  ;;  %3032 = vperm.xlu0 %4642, %v2853_v29  }
 0x17c   : > { %4399 = vmatprep.mubr.msk.f32.mxu1 %vm1162_vm1, %v4823_v18  ;;  %v2910_v12 = vpop.permute.xlu0 %2909 }
 0x17e   : > { %2981 = vperm.xlu1 %4643, %v2836_v53  }
 0x17f   : > { %4400 = vmatmul.mubr.msk.f32.gmra.mrb[74].mxu1 %vm1162_vm1, %v4825_v22  ;;  %2984 = vperm.xlu0 %4642, %v2837_v55  }
 0x180   : > { %4402 = vmatprep.mubr.msk.f32.mxu1 %vm1162_vm1, %v4827_v24  ;;  %v2916_v30 = vpop.permute.xlu0 %2915 }
 0x182   : > { %3035 = vperm.xlu1 %4643, %v2854_v21   ;;  %v5173_v21 = vmov 1.0|1.0  }
 0x183   : > { %4403 = vmatmul.mubr.msk.f32.gmra.mrb[76].mxu1 %vm1162_vm1, %v4829_v31  ;;  %3038 = vperm.xlu0 %4642, %v2855_v44  }
 0x184   : > { %4405 = vmatprep.mubr.msk.f32.mxu1 %vm1162_vm1, %v4831_v32 }
 0x186   : > { %2987 = vperm.xlu1 %4643, %v2838_v56  }
 0x187   : > { %4406 = vmatmul.mubr.msk.f32.gmra.mrb[78].mxu1 %vm1162_vm1, %v4833_v1  ;;  %2990 = vperm.xlu0 %4642, %v2839_v58  }
 0x188   : > { %4408 = vmatprep.mubr.msk.f32.mxu1 %vm1162_vm1, %v4835_v35  ;;  %v5727_v35 = vand.u32 127, %v2794_v52 }
 0x18a   : > { %3041 = vperm.xlu1 %4643, %v2856_v27   ;;  %vm3068_vm2 = vcmp.eq.s32.totalorder %v2910_v12, %v5727_v35  ;;  %vm3053_vm4 = vcmp.eq.s32.totalorder %v5670_v60, %v5727_v35  ;;  %vm3052_vm5 = vcmp.eq.s32.totalorder %v2862_v14, %v5727_v35  ;;  %vm3070_vm6 = vcmp.eq.s32.totalorder %v2916_v30, %v5727_v35 }
 0x18b   : > { %4409 = vmatmul.mubr.msk.f32.gmra.mrb[80].mxu1 %vm1162_vm1, %v4837_v10  ;;  %3044 = vperm.xlu0 %4642, %v2857_v59   ;;  %vm5748_vm9 = vmpackc.low %vm3053_vm4, %vm3052_vm5  ;;  %vm3054_vm10 = vcmp.eq.s32.totalorder %v5674_v62, %v5727_v35  ;;  %vm3055_vm11 = vcmp.eq.s32.totalorder %v5678_v2, %v5727_v35  ;;  %vm3056_vm0 = vcmp.eq.s32.totalorder %v5682_v5, %v5727_v35 }
 0x18c   : > { %4411 = vmatprep.mubr.msk.f32.mxu1 %vm1162_vm1, %v4839_v61  ;;  %v5684_v0 = vpop.permute.xlu1 %2876  ;;  %vm5781_vm15 = vmpackc.low %vm3055_vm11, %vm3054_vm10 }
 0x18e   : > { %2993 = vperm.xlu1 %4643, %v2840_v57  }
 0x18f   : > { %4412 = vmatmul.mubr.msk.f32.gmra.mrb[82].mxu1 %vm1162_vm1, %v4841_v17  ;;  %2996 = vperm.xlu0 %4642, %v2841_v40  }
 0x190   : > { %4414 = vmatprep.mubr.msk.f32.mxu1 %vm1162_vm1, %v4843_v43  ;;  %v5696_v18 = vpop.permute.xlu0 %2921 }
 0x191   : > { %vm3072_vm13 = vcmp.eq.s32.totalorder %v5696_v18, %v5727_v35 }
 0x192   : > { %3047 = vperm.xlu1 %4643, %v2858_v54  }
 0x193   : > { %4415 = vmatmul.mubr.msk.f32.gmra.mrb[84].mxu1 %vm1162_vm1, %v4845_v47  ;;  %3050 = vperm.xlu0 %4642, %v2859_v63   ;;  %v5686_v6 = vpop.permute.xlu1 %2879 }
 0x194   : > { %v5700_v19 = vpop.permute.xlu0 %2927 }
 0x195   : > { %vm3074_vm4 = vcmp.eq.s32.totalorder %v5700_v19, %v5727_v35 }
 0x196   : > { %2999 = vperm.xlu1 %4643, %v2842_v3  }
 0x197   : > { %3002 = vperm.xlu0 %4642, %v2843_v4   ;;  %v5688_v7 = vpop.permute.xlu1 %2882 }
 0x199   : > { %v5704_v41 = vpop.permute.xlu0 %2933 }
 0x19a   : > { %vm3076_vm10 = vcmp.eq.s32.totalorder %v5704_v41, %v5727_v35 }
 0x19b   : > { %v5690_v8 = vpop.permute.xlu1 %2885 }
 0x19d   : > { %v5708_v24 = vpop.permute.xlu0 %2939 }
 0x19f   : > { %v5694_v11 = vpop.permute.xlu1 %2891 }
 0x1a3   : > { %v2913_v13 = vpop.permute.xlu1 %2912  ;;  %v5716_v26 = vpop.permute.xlu0 %2894 }
 0x1a4   : > { %vm3069_vm3 = vcmp.eq.s32.totalorder %v2913_v13, %v5727_v35 }
 0x1a5   : > { %vm4541_vm8 = vmpackc.low %vm3069_vm3, %vm3068_vm2  ;;  %vm3057_vm2 = vcmp.eq.s32.totalorder %v5684_v0, %v5727_v35 }
 0x1a6   : > { %4542 = vmatprep.subr.msk.bf16.mxu1 %vm4541_vm8, %v5173_v21  ;;  %vm3059_vm8 = vcmp.eq.s32.totalorder %v5688_v7, %v5727_v35 }
 0x1a7   : > { %v2919_v16 = vpop.permute.xlu1 %2918  ;;  %4544 = vmatpush3.bf16.msk.msra.mxu1 %vm5748_vm9, %v5173_v21 }
 0x1a8   : > { %vm3071_vm7 = vcmp.eq.s32.totalorder %v2919_v16, %v5727_v35 }
 0x1a9   : > { %vm5756_vm12 = vmpackc.low %vm3071_vm7, %vm3070_vm6  ;;  %vm3058_vm7 = vcmp.eq.s32.totalorder %v5686_v6, %v5727_v35 }
 0x1aa   : > { %4546 = vmatprep.subr.msk.bf16.mxu1 %vm5756_vm12, %v5173_v21  ;;  %vm5820_vm6 = vmpackc.low %vm3057_vm2, %vm3056_vm0  ;;  %vm3061_vm0 = vcmp.eq.s32.totalorder %v5692_v9, %v5727_v35 }
 0x1ab   : > { %v5698_v25 = vpop.permute.xlu1 %2924  ;;  %4548 = vmatpush3.bf16.msk.msra.mxu1 %vm5781_vm15, %v5173_v21  ;;  %vm3060_vm15 = vcmp.eq.s32.totalorder %v5690_v8, %v5727_v35 }
 0x1ac   : > { %vm3073_vm14 = vcmp.eq.s32.totalorder %v5698_v25, %v5727_v35 }
 0x1ad   : > { %vm5799_vm3 = vmpackc.low %vm3073_vm14, %vm3072_vm13 }
 0x1ae   : > { %4550 = vmatprep.subr.msk.bf16.mxu1 %vm5799_vm3, %v5173_v21  ;;  %vm5852_vm13 = vmpackc.low %vm3059_vm8, %vm3058_vm7 }
 0x1af   : > { %v5702_v20 = vpop.permute.xlu1 %2930  ;;  %4552 = vmatpush3.bf16.msk.msra.mxu1 %vm5820_vm6, %v5173_v21  ;;  %vm5896_vm7 = vmpackc.low %vm3061_vm0, %vm3060_vm15 }
 0x1b0   : > { %vm3075_vm5 = vcmp.eq.s32.totalorder %v5702_v20, %v5727_v35 }
 0x1b1   : > { %vm5835_vm9 = vmpackc.low %vm3075_vm5, %vm3074_vm4  ;;  %vm3078_vm4 = vcmp.eq.s32.totalorder %v5708_v24, %v5727_v35 }
 0x1b2   : > { %4554 = vmatprep.subr.msk.bf16.mxu1 %vm5835_vm9, %v5173_v21  ;;  %vm3062_vm9 = vcmp.eq.s32.totalorder %v5694_v11, %v5727_v35 }
 0x1b3   : > { %v5706_v22 = vpop.permute.xlu1 %2936  ;;  %4556 = vmatpush3.bf16.msk.msra.mxu1 %vm5852_vm13, %v5173_v21 }
 0x1b4   : > { %vm3077_vm11 = vcmp.eq.s32.totalorder %v5706_v22, %v5727_v35 }
 0x1b5   : > { %vm5879_vm3 = vmpackc.low %vm3077_vm11, %vm3076_vm10  ;;  %vm3063_vm10 = vcmp.eq.s32.totalorder %v5716_v26, %v5727_v35 }
 0x1b6   : > { %4558 = vmatprep.subr.msk.bf16.mxu1 %vm5879_vm3, %v5173_v21  ;;  %vm5940_vm0 = vmpackc.low %vm3063_vm10, %vm3062_vm9 }
 0x1b7   : > { %4560 = vmatpush3.bf16.msk.msra.mxu1 %vm5896_vm7, %v5173_v21 }
 0x1b8   : > { %v5714_v37 = vpop.permute.xlu1 %2942 }
 0x1b9   : > { %vm3079_vm5 = vcmp.eq.s32.totalorder %v5714_v37, %v5727_v35 }
 0x1c9   : > { %v5720_v32 = vpop.permute.xlu1 %2945 }
 0x1ca   : > { %v5723_v34 = vpop.permute.xlu0 %2948  ;;  %vm3080_vm13 = vcmp.eq.s32.totalorder %v5720_v32, %v5727_v35 }
 0x1cd   : > { %v5729_v38 = vpop.permute.xlu1 %2897 }
 0x1ce   : > { %v5732_v39 = vpop.permute.xlu0 %2900 }
 0x1d1   : > { %v5740_v43 = vpop.permute.xlu1 %2951 }
 0x1d2   : > { %v5745_v47 = vpop.permute.xlu0 %2954 }
 0x1d3   : > { %vm3083_vm9 = vcmp.eq.s32.totalorder %v5745_v47, %v5727_v35 }
 0x1d5   : > { %v5760_v51 = vpop.permute.xlu1 %2903 }
 0x1d6   : > { %v5767_v55 = vpop.permute.xlu0 %2906 }
 0x1d9   : > { %v5803_v57 = vpop.permute.xlu1 %3005 }
 0x1da   : > { %v5810_v54 = vpop.permute.xlu0 %3008 }
 0x1dd   : > { %v2958_v14 = vpop.permute.xlu1 %2957 }
 0x1de   : > { %vm3084_vm12 = vcmp.eq.s32.totalorder %v2958_v14, %v5727_v35  ;;  %v2961_v30 = vpop.permute.xlu0 %2960 }
 0x1df   : > { %vm3085_vm14 = vcmp.eq.s32.totalorder %v2961_v30, %v5727_v35 }
 0x1e0   : > { %vm5865_vm2 = vmpackc.low %vm3085_vm14, %vm3084_vm12  ;;  %vm3081_vm14 = vcmp.eq.s32.totalorder %v5723_v34, %v5727_v35 }
 0x1e1   : > { %vm5923_vm12 = vmpackc.low %vm3079_vm5, %vm3078_vm4  ;;  %vm3064_vm4 = vcmp.eq.s32.totalorder %v5729_v38, %v5727_v35  ;;  %vm3065_vm5 = vcmp.eq.s32.totalorder %v5732_v39, %v5727_v35 }
 0x1e2   : > { %v3015_v41 = vpop.permute.xlu0 %3014  ;;  %4562 = vmatprep.subr.msk.bf16.mxu1 %vm5923_vm12, %v5173_v21  ;;  %vm5967_vm7 = vmpackc.low %vm3081_vm14, %vm3080_vm13  ;;  %vm3066_vm14 = vcmp.eq.s32.totalorder %v5760_v51, %v5727_v35 }
 0x1e3   : > { %vm3103_vm8 = vcmp.eq.s32.totalorder %v3015_v41, %v5727_v35  ;;  %vm5984_vm12 = vmpackc.low %vm3065_vm5, %vm3064_vm4  ;;  %4564 = vmatpush3.bf16.msk.msra.mxu1 %vm5940_vm0, %v5173_v21  ;;  %vm3100_vm4 = vcmp.eq.s32.totalorder %v5803_v57, %v5727_v35  ;;  %vm3101_vm5 = vcmp.eq.s32.totalorder %v5810_v54, %v5727_v35  ;;  %v3514_v54 = vshrl.u32 %v2794_v52, 7 }
 0x1e4   : > { %4566 = vmatprep.subr.msk.bf16.mxu1 %vm5967_vm7, %v5173_v21 }
 0x1e6   : > { %v2967_v24 = vpop.permute.xlu0 %2966 }
 0x1e7   : > { %vm3087_vm3 = vcmp.eq.s32.totalorder %v2967_v24, %v5727_v35  ;;  %4568 = vmatpush3.bf16.msk.msra.mxu1 %vm5984_vm12, %v5173_v21  ;;  %vm4573_vm12 = vmpackc.low %vm3101_vm5, %vm3100_vm4 }
 0x1ea   : > { %v4323_v31 = vpop.f32.mrb[22].mxu1  ;;  %v3021_v32 = vpop.permute.xlu0 %3020 }
 0x1eb   : > { %v1427_v49 = vadd.f32 %v4323_v31, %v5718_v28  ;;  %v1421_v33 = vpop.f32.mrb[23].mxu1  ;;  %v3012_v31 = vpop.permute.xlu1 %3011  ;;  %vm3105_vm13 = vcmp.eq.s32.totalorder %v3021_v32, %v5727_v35 }
 0x1ec   : > { %v1422_v1 = vadd.f32 %v5718_v28, %v1421_v33  ;;  %vm3102_vm6 = vcmp.eq.s32.totalorder %v3012_v31, %v5727_v35 }
 0x1ed   : > { %vm5909_vm11 = vmpackc.low %vm3103_vm8, %vm3102_vm6  ;;  %vm3082_vm8 = vcmp.eq.s32.totalorder %v5740_v43, %v5727_v35 }
 0x1ee   : > { %4846 = vtanh.f32 %v1422_v1  ;;  %v4326_v36 = vpop.f32.mrb[24].mxu1  ;;  %vm6011_vm0 = vmpackc.low %vm3083_vm9, %vm3082_vm8  ;;  %v2973_v43 = vpop.permute.xlu0 %2972 }
 0x1ef   : > { %4848 = vtanh.f32 %v1427_v49  ;;  %v1437_v10 = vadd.f32 %v4326_v36, %v5718_v28  ;;  %v1431_v61 = vpop.f32.mrb[25].mxu1  ;;  %vm3089_vm9 = vcmp.eq.s32.totalorder %v2973_v43, %v5727_v35  ;;  %4570 = vmatprep.subr.msk.bf16.mxu1 %vm6011_vm0, %v5173_v21 }
 0x1f0   : > { %v1432_v42 = vadd.f32 %v5718_v28, %v1431_v61 }
 0x1f2   : > { %4850 = vtanh.f32 %v1432_v42  ;;  %v4329_v17 = vpop.f32.mrb[26].mxu1  ;;  %v2964_v42 = vpop.permute.xlu1 %2963 }
 0x1f3   : > { %4852 = vtanh.f32 %v1437_v10  ;;  %v1447_v45 = vadd.f32 %v4329_v17, %v5718_v28  ;;  %v1441_v46 = vpop.f32.mrb[27].mxu1  ;;  %vm3086_vm15 = vcmp.eq.s32.totalorder %v2964_v42, %v5727_v35  ;;  %v3027_v5 = vpop.permute.xlu0 %3026 }
 0x1f4   : > { %v1442_v48 = vadd.f32 %v5718_v28, %v1441_v46  ;;  %vm5953_vm6 = vmpackc.low %vm3087_vm3, %vm3086_vm15  ;;  %vm3067_vm15 = vcmp.eq.s32.totalorder %v5767_v55, %v5727_v35 }
 0x1f5   : > { %vm6028_vm8 = vmpackc.low %vm3067_vm15, %vm3066_vm14  ;;  %vm3107_vm14 = vcmp.eq.s32.totalorder %v3027_v5, %v5727_v35 }
 0x1f6   : > { %4854 = vtanh.f32 %v1442_v48  ;;  %v4332_v23 = vpop.f32.mrb[28].mxu1  ;;  %v3018_v15 = vpop.permute.xlu1 %3017  ;;  %4572 = vmatpush3.bf16.msk.msra.mxu1 %vm6028_vm8, %v5173_v21 }
 0x1f7   : > { %4856 = vtanh.f32 %v1447_v45  ;;  %v1457_v29 = vadd.f32 %v4332_v23, %v5718_v28  ;;  %v1451_v53 = vpop.f32.mrb[29].mxu1  ;;  %vm3104_vm10 = vcmp.eq.s32.totalorder %v3018_v15, %v5727_v35  ;;  %4574 = vmatprep.subr.msk.bf16.mxu1 %vm4573_vm12, %v5173_v21  ;;  %v2979_v25 = vpop.permute.xlu0 %2978 }
 0x1f8   : > { %v4847_v44 = vpop.eup %4846  ;;  %v1452_v56 = vadd.f32 %v5718_v28, %v1451_v53  ;;  %vm5997_vm3 = vmpackc.low %vm3105_vm13, %vm3104_vm10  ;;  %vm3091_vm4 = vcmp.eq.s32.totalorder %v2979_v25, %v5727_v35 }
 0x1f9   : > { %v4849_v58 = vpop.eup %4848  ;;  %4425 = vmatprep.mubr.msk.f32.mxu0 %vm1162_vm1, %v4847_v44 }
 0x1fa   : > { %4858 = vtanh.f32 %v1452_v56  ;;  %v4335_v59 = vpop.f32.mrb[30].mxu1  ;;  %4426 = vmatmul.mubr.msk.f32.vlgmr.msra.gmra.mrb[42].mxu0 %vm1162_vm1, %v4849_v58 }
 0x1fb   : > { %4860 = vtanh.f32 %v1457_v29  ;;  %v1467_v40 = vadd.f32 %v4335_v59, %v5718_v28  ;;  %v1461_v62 = vpop.f32.mrb[31].mxu1  ;;  %v2970_v59 = vpop.permute.xlu1 %2969 }
 0x1fc   : > { %v4851_v63 = vpop.eup %4850  ;;  %v1462_v2 = vadd.f32 %v5718_v28, %v1461_v62  ;;  %vm3088_vm7 = vcmp.eq.s32.totalorder %v2970_v59, %v5727_v35 }
 0x1fd   : > { %v4853_v3 = vpop.eup %4852  ;;  %4428 = vmatprep.mubr.msk.f32.mxu0 %vm1162_vm1, %v4851_v63  ;;  %vm6037_vm10 = vmpackc.low %vm3089_vm9, %vm3088_vm7 }
 0x1fe   : > { %4862 = vtanh.f32 %v1462_v2  ;;  %v4338_v0 = vpop.f32.mrb[32].mxu1  ;;  %4429 = vmatmul.mubr.msk.f32.gmra.mrb[44].mxu0 %vm1162_vm1, %v4853_v3 }
 0x1ff   : > { %4864 = vtanh.f32 %v1467_v40  ;;  %v1477_v12 = vadd.f32 %v4338_v0, %v5718_v28  ;;  %v1471_v13 = vpop.f32.mrb[33].mxu1  ;;  %v3024_v55 = vpop.permute.xlu1 %3023 }
 0x200   : > { %v4855_v16 = vpop.eup %4854  ;;  %v1472_v18 = vadd.f32 %v5718_v28, %v1471_v13  ;;  %vm3106_vm13 = vcmp.eq.s32.totalorder %v3024_v55, %v5727_v35 }
 0x201   : > { %v4857_v19 = vpop.eup %4856  ;;  %4431 = vmatprep.mubr.msk.f32.mxu0 %vm1162_vm1, %v4855_v16  ;;  %vm6059_vm15 = vmpackc.low %vm3107_vm14, %vm3106_vm13 }
 0x202   : > { %4866 = vtanh.f32 %v1472_v18  ;;  %v4341_v7 = vpop.f32.mrb[34].mxu1  ;;  %4432 = vmatmul.mubr.msk.f32.gmra.mrb[46].mxu0 %vm1162_vm1, %v4857_v19 }
 0x203   : > { %4868 = vtanh.f32 %v1477_v12  ;;  %v1487_v49 = vadd.f32 %v4341_v7, %v5718_v28  ;;  %v1481_v33 = vpop.f32.mrb[35].mxu1  ;;  %v2976_v30 = vpop.permute.xlu1 %2975 }
 0x204   : > { %v4859_v1 = vpop.eup %4858  ;;  %v1482_v22 = vadd.f32 %v5718_v28, %v1481_v33  ;;  %vm3090_vm0 = vcmp.eq.s32.totalorder %v2976_v30, %v5727_v35 }
 0x205   : > { %v4861_v10 = vpop.eup %4860  ;;  %4434 = vmatprep.mubr.msk.f32.mxu0 %vm1162_vm1, %v4859_v1  ;;  %vm6070_vm5 = vmpackc.low %vm3091_vm4, %vm3090_vm0 }
 0x206   : > { %4870 = vtanh.f32 %v1482_v22  ;;  %v4344_v9 = vpop.f32.mrb[36].mxu1  ;;  %4435 = vmatmul.mubr.msk.f32.gmra.mrb[48].mxu0 %vm1162_vm1, %v4861_v10  ;;  %v3033_v22 = vpop.permute.xlu0 %3032 }
 0x207   : > { %4872 = vtanh.f32 %v1487_v49  ;;  %v1497_v17 = vadd.f32 %v4344_v9, %v5718_v28  ;;  %v1491_v45 = vpop.f32.mrb[37].mxu1  ;;  %v3030_v33 = vpop.permute.xlu1 %3029  ;;  %vm3109_vm8 = vcmp.eq.s32.totalorder %v3033_v22, %v5727_v35 }
 0x208   : > { %v4863_v46 = vpop.eup %4862  ;;  %v1492_v37 = vadd.f32 %v5718_v28, %v1491_v45  ;;  %vm3108_vm7 = vcmp.eq.s32.totalorder %v3030_v33, %v5727_v35 }
 0x209   : > { %v4865_v50 = vpop.eup %4864  ;;  %4437 = vmatprep.mubr.msk.f32.mxu0 %vm1162_vm1, %v4863_v46  ;;  %vm6080_vm9 = vmpackc.low %vm3109_vm8, %vm3108_vm7 }
 0x20a   : > { %4874 = vtanh.f32 %v1492_v37  ;;  %v4347_v26 = vpop.f32.mrb[38].mxu1  ;;  %4438 = vmatmul.mubr.msk.f32.gmra.mrb[50].mxu0 %vm1162_vm1, %v4865_v50  ;;  %v2985_v46 = vpop.permute.xlu0 %2984 }
 0x20b   : > { %4876 = vtanh.f32 %v1497_v17  ;;  %v1507_v29 = vadd.f32 %v4347_v26, %v5718_v28  ;;  %v1501_v53 = vpop.f32.mrb[39].mxu1  ;;  %v2982_v17 = vpop.permute.xlu1 %2981  ;;  %vm3093_vm13 = vcmp.eq.s32.totalorder %v2985_v46, %v5727_v35 }
 0x20c   : > { %v4867_v44 = vpop.eup %4866  ;;  %v1502_v34 = vadd.f32 %v5718_v28, %v1501_v53  ;;  %vm3092_vm12 = vcmp.eq.s32.totalorder %v2982_v17, %v5727_v35 }
 0x20d   : > { %v4869_v58 = vpop.eup %4868  ;;  %4440 = vmatprep.mubr.msk.f32.mxu0 %vm1162_vm1, %v4867_v44  ;;  %vm6090_vm14 = vmpackc.low %vm3093_vm13, %vm3092_vm12 }
 0x20e   : > { %4878 = vtanh.f32 %v1502_v34  ;;  %v4350_v39 = vpop.f32.mrb[40].mxu1  ;;  %4441 = vmatmul.mubr.msk.f32.gmra.mrb[52].mxu0 %vm1162_vm1, %v4869_v58  ;;  %v3039_v32 = vpop.permute.xlu0 %3038  ;;  %v3515_v58 = vsub.s32 0, %v3514_v54 }
 0x20f   : > { %4880 = vtanh.f32 %v1507_v29  ;;  %v1517_v60 = vadd.f32 %v4350_v39, %v5718_v28  ;;  %v1511_v40 = vpop.f32.mrb[41].mxu1  ;;  %v3036_v15 = vpop.permute.xlu1 %3035  ;;  %vm3111_vm4 = vcmp.eq.s32.totalorder %v3039_v32, %v5727_v35 }
 0x210   : > { %v4871_v62 = vpop.eup %4870  ;;  %v1512_v47 = vadd.f32 %v5718_v28, %v1511_v40  ;;  %vm3110_vm0 = vcmp.eq.s32.totalorder %v3036_v15, %v5727_v35 }
 0x211   : > { %v4873_v2 = vpop.eup %4872  ;;  %4443 = vmatprep.mubr.msk.f32.mxu0 %vm1162_vm1, %v4871_v62  ;;  %vm6100_vm7 = vmpackc.low %vm3111_vm4, %vm3110_vm0 }
 0x212   : > { %4882 = vtanh.f32 %v1512_v47  ;;  %v4353_v51 = vpop.f32.mrb[42].mxu1  ;;  %4444 = vmatmul.mubr.msk.f32.gmra.mrb[54].mxu0 %vm1162_vm1, %v4873_v2  ;;  %v2991_v40 = vpop.permute.xlu0 %2990 }
 0x213   : > { %4884 = vtanh.f32 %v1517_v60  ;;  %v1527_v4 = vadd.f32 %v4353_v51, %v5718_v28  ;;  %v1521_v0 = vpop.f32.mrb[43].mxu1  ;;  %v2988_v27 = vpop.permute.xlu1 %2987  ;;  %vm3095_vm12 = vcmp.eq.s32.totalorder %v2991_v40, %v5727_v35 }
 0x214   : > { %v4875_v14 = vpop.eup %4874  ;;  %v1522_v12 = vadd.f32 %v5718_v28, %v1521_v0  ;;  %vm3094_vm8 = vcmp.eq.s32.totalorder %v2988_v27, %v5727_v35 }
 0x215   : > { %v4877_v57 = vpop.eup %4876  ;;  %4446 = vmatprep.mubr.msk.f32.mxu0 %vm1162_vm1, %v4875_v14  ;;  %vm6110_vm13 = vmpackc.low %vm3095_vm12, %vm3094_vm8 }
 0x216   : > { %4886 = vtanh.f32 %v1522_v12  ;;  %v4356_v13 = vpop.f32.mrb[44].mxu1  ;;  %4447 = vmatmul.mubr.msk.f32.gmra.mrb[56].mxu0 %vm1162_vm1, %v4877_v57  ;;  %v3045_v0 = vpop.permute.xlu0 %3044  ;;  %v6675_v57 = vmov 0 }
 0x217   : > { %4888 = vtanh.f32 %v1527_v4  ;;  %v1537_v16 = vadd.f32 %v4356_v13, %v5718_v28  ;;  %v1531_v18 = vpop.f32.mrb[45].mxu1  ;;  %v3042_v51 = vpop.permute.xlu1 %3041  ;;  %vm3113_vm4 = vcmp.eq.s32.totalorder %v3045_v0, %v5727_v35 }
 0x218   : > { %v4879_v19 = vpop.eup %4878  ;;  %v1532_v7 = vadd.f32 %v5718_v28, %v1531_v18  ;;  %vm3112_vm0 = vcmp.eq.s32.totalorder %v3042_v51, %v5727_v35 }
 0x219   : > { %v4881_v20 = vpop.eup %4880  ;;  %4449 = vmatprep.mubr.msk.f32.mxu0 %vm1162_vm1, %v4879_v19  ;;  %vm6120_vm8 = vmpackc.low %vm3113_vm4, %vm3112_vm0 }
 0x21a   : > { %4890 = vtanh.f32 %v1532_v7  ;;  %v4359_v49 = vpop.f32.mrb[46].mxu1  ;;  %4450 = vmatmul.mubr.msk.f32.gmra.mrb[58].mxu0 %vm1162_vm1, %v4881_v20  ;;  %v6676_v57 = vsel %vm6120_vm8, 4294967295, %v6675_v57  ;;  %v2997_v25 = vpop.permute.xlu0 %2996 }
 0x21b   : > { %4892 = vtanh.f32 %v1537_v16  ;;  %v1547_v41 = vadd.f32 %v4359_v49, %v5718_v28  ;;  %v1541_v1 = vpop.f32.mrb[47].mxu1  ;;  %v2994_v30 = vpop.permute.xlu1 %2993  ;;  %vm3097_vm0 = vcmp.eq.s32.totalorder %v2997_v25, %v5727_v35 }
 0x21c   : > { %v4883_v36 = vpop.eup %4882  ;;  %v1542_v10 = vadd.f32 %v5718_v28, %v1541_v1  ;;  %vm3096_vm12 = vcmp.eq.s32.totalorder %v2994_v30, %v5727_v35 }
 0x21d   : > { %v4885_v9 = vpop.eup %4884  ;;  %4452 = vmatprep.mubr.msk.f32.mxu0 %vm1162_vm1, %v4883_v36  ;;  %vm6130_vm4 = vmpackc.low %vm3097_vm0, %vm3096_vm12 }
 0x21e   : > { %4894 = vtanh.f32 %v1542_v10  ;;  %v4362_v42 = vpop.f32.mrb[48].mxu1  ;;  %4453 = vmatmul.mubr.msk.f32.gmra.mrb[60].mxu0 %vm1162_vm1, %v4885_v9  ;;  %v3051_v36 = vpop.permute.xlu0 %3050 }
 0x21f   : > { %4896 = vtanh.f32 %v1547_v41  ;;  %v1557_v45 = vadd.f32 %v4362_v42, %v5718_v28  ;;  %v1551_v24 = vpop.f32.mrb[49].mxu1  ;;  %v3048_v41 = vpop.permute.xlu1 %3047  ;;  %vm3115_vm12 = vcmp.eq.s32.totalorder %v3051_v36, %v5727_v35 }
 0x220   : > { %v4887_v37 = vpop.eup %4886  ;;  %v1552_v48 = vadd.f32 %v5718_v28, %v1551_v24  ;;  %vm3114_vm8 = vcmp.eq.s32.totalorder %v3048_v41, %v5727_v35 }
 0x221   : > { %v4889_v50 = vpop.eup %4888  ;;  %4455 = vmatprep.mubr.msk.f32.mxu0 %vm1162_vm1, %v4887_v37  ;;  %vm6140_vm0 = vmpackc.low %vm3115_vm12, %vm3114_vm8 }
 0x222   : > { %4898 = vtanh.f32 %v1552_v48  ;;  %v4365_v23 = vpop.f32.mrb[50].mxu1  ;;  %4456 = vmatmul.mubr.msk.f32.gmra.mrb[62].mxu0 %vm1162_vm1, %v4889_v50 }
 0x223   : > { %4900 = vtanh.f32 %v1557_v45  ;;  %v1567_v29 = vadd.f32 %v4365_v23, %v5718_v28  ;;  %v1561_v53 = vpop.f32.mrb[51].mxu1 }
 0x224   : > { %v4891_v44 = vpop.eup %4890  ;;  %v1562_v34 = vadd.f32 %v5718_v28, %v1561_v53 }
 0x225   : > { %v4893_v56 = vpop.eup %4892  ;;  %4458 = vmatprep.mubr.msk.f32.mxu0 %vm1162_vm1, %v4891_v44 }
 0x226   : > { %4902 = vtanh.f32 %v1562_v34  ;;  %v4368_v39 = vpop.f32.mrb[52].mxu1  ;;  %4459 = vmatmul.mubr.msk.f32.gmra.mrb[64].mxu0 %vm1162_vm1, %v4893_v56 }
 0x227   : > { %4904 = vtanh.f32 %v1567_v29  ;;  %v1577_v59 = vadd.f32 %v4368_v39, %v5718_v28  ;;  %v1571_v60 = vpop.f32.mrb[53].mxu1 }
 0x228   : > { %v4895_v43 = vpop.eup %4894  ;;  %v1572_v62 = vadd.f32 %v5718_v28, %v1571_v60 }
 0x229   : > { %v4897_v47 = vpop.eup %4896  ;;  %4461 = vmatprep.mubr.msk.f32.mxu0 %vm1162_vm1, %v4895_v43 }
 0x22a   : > { %4906 = vtanh.f32 %v1572_v62  ;;  %v4371_v2 = vpop.f32.mrb[54].mxu1  ;;  %4462 = vmatmul.mubr.msk.f32.gmra.mrb[66].mxu0 %vm1162_vm1, %v4897_v47 }
 0x22b   : > { %4908 = vtanh.f32 %v1577_v59  ;;  %v1587_v55 = vadd.f32 %v4371_v2, %v5718_v28  ;;  %v1581_v4 = vpop.f32.mrb[55].mxu1 }
 0x22c   : > { %v4899_v5 = vpop.eup %4898  ;;  %v1582_v14 = vadd.f32 %v5718_v28, %v1581_v4 }
 0x22d   : > { %v4901_v12 = vpop.eup %4900  ;;  %4464 = vmatprep.mubr.msk.f32.mxu0 %vm1162_vm1, %v4899_v5 }
 0x22e   : > { %4910 = vtanh.f32 %v1582_v14  ;;  %v4374_v13 = vpop.f32.mrb[56].mxu1  ;;  %4465 = vmatmul.mubr.msk.f32.gmra.mrb[68].mxu0 %vm1162_vm1, %v4901_v12 }
 0x22f   : > { %4912 = vtanh.f32 %v1587_v55  ;;  %v1597_v16 = vadd.f32 %v4374_v13, %v5718_v28  ;;  %v1591_v18 = vpop.f32.mrb[57].mxu1 }
 0x230   : > { %v4903_v19 = vpop.eup %4902  ;;  %v1592_v7 = vadd.f32 %v5718_v28, %v1591_v18 }
 0x231   : > { %v4905_v20 = vpop.eup %4904  ;;  %4467 = vmatprep.mubr.msk.f32.mxu0 %vm1162_vm1, %v4903_v19 }
 0x232   : > { %4914 = vtanh.f32 %v1592_v7  ;;  %v4377_v33 = vpop.f32.mrb[58].mxu1  ;;  %4468 = vmatmul.mubr.msk.f32.gmra.mrb[70].mxu0 %vm1162_vm1, %v4905_v20 }
 0x233   : > { %4916 = vtanh.f32 %v1597_v16  ;;  %v1607_v1 = vadd.f32 %v4377_v33, %v5718_v28  ;;  %v1601_v22 = vpop.f32.mrb[59].mxu1 }
 0x234   : > { %v4907_v10 = vpop.eup %4906  ;;  %v1602_v9 = vadd.f32 %v5718_v28, %v1601_v22 }
 0x235   : > { %v4909_v42 = vpop.eup %4908  ;;  %4470 = vmatprep.mubr.msk.f32.mxu0 %vm1162_vm1, %v4907_v10 }
 0x236   : > { %4918 = vtanh.f32 %v1602_v9  ;;  %v4380_v45 = vpop.f32.mrb[60].mxu1  ;;  %4471 = vmatmul.mubr.msk.f32.gmra.mrb[72].mxu0 %vm1162_vm1, %v4909_v42 }
 0x237   : > { %4920 = vtanh.f32 %v1607_v1  ;;  %v1617_v24 = vadd.f32 %v4380_v45, %v5718_v28  ;;  %v1611_v46 = vpop.f32.mrb[61].mxu1 }
 0x238   : > { %v4911_v37 = vpop.eup %4910  ;;  %v1612_v48 = vadd.f32 %v5718_v28, %v1611_v46 }
 0x239   : > { %v4913_v50 = vpop.eup %4912  ;;  %4473 = vmatprep.mubr.msk.f32.mxu0 %vm1162_vm1, %v4911_v37 }
 0x23a   : > { %4922 = vtanh.f32 %v1612_v48  ;;  %v4383_v23 = vpop.f32.mrb[62].mxu1  ;;  %4474 = vmatmul.mubr.msk.f32.gmra.mrb[74].mxu0 %vm1162_vm1, %v4913_v50 }
 0x23b   : > { %4924 = vtanh.f32 %v1617_v24  ;;  %v1627_v15 = vadd.f32 %v4383_v23, %v5718_v28  ;;  %v1621_v29 = vpop.f32.mrb[63].mxu1 }
 0x23c   : > { %v4915_v53 = vpop.eup %4914  ;;  %v1622_v32 = vadd.f32 %v5718_v28, %v1621_v29 }
 0x23d   : > { %v4917_v44 = vpop.eup %4916  ;;  %4476 = vmatprep.mubr.msk.f32.mxu0 %vm1162_vm1, %v4915_v53 }
 0x23e   : > { %4926 = vtanh.f32 %v1622_v32  ;;  %v4386_v34 = vpop.f32.mrb[64].mxu1  ;;  %4477 = vmatmul.mubr.msk.f32.gmra.mrb[76].mxu0 %vm1162_vm1, %v4917_v44 }
 0x23f   : > { %4928 = vtanh.f32 %v1627_v15  ;;  %v1637_v56 = vadd.f32 %v4386_v34, %v5718_v28  ;;  %v1631_v39 = vpop.f32.mrb[65].mxu1 }
 0x240   : > { %v4919_v27 = vpop.eup %4918  ;;  %v1632_v59 = vadd.f32 %v5718_v28, %v1631_v39 }
 0x241   : > { %v4921_v60 = vpop.eup %4920  ;;  %4479 = vmatprep.mubr.msk.f32.mxu0 %vm1162_vm1, %v4919_v27 }
 0x242   : > { %4930 = vtanh.f32 %v1632_v59  ;;  %v4389_v40 = vpop.f32.mrb[66].mxu1  ;;  %4480 = vmatmul.mubr.msk.f32.gmra.mrb[78].mxu0 %vm1162_vm1, %v4921_v60 }
 0x243   : > { %4932 = vtanh.f32 %v1637_v56  ;;  %v1647_v43 = vadd.f32 %v4389_v40, %v5718_v28  ;;  %v1641_v62 = vpop.f32.mrb[67].mxu1 }
 0x244   : > { %v4923_v47 = vpop.eup %4922  ;;  %v1642_v2 = vadd.f32 %v5718_v28, %v1641_v62 }
 0x245   : > { %v4925_v51 = vpop.eup %4924  ;;  %4482 = vmatprep.mubr.msk.f32.mxu0 %vm1162_vm1, %v4923_v47 }
 0x246   : > { %4934 = vtanh.f32 %v1642_v2  ;;  %v4392_v55 = vpop.f32.mrb[68].mxu1  ;;  %4483 = vmatmul.mubr.msk.f32.gmra.mrb[80].mxu0 %vm1162_vm1, %v4925_v51 }
 0x247   : > { %4936 = vtanh.f32 %v1647_v43  ;;  %v1657_v4 = vadd.f32 %v4392_v55, %v5718_v28  ;;  %v1651_v0 = vpop.f32.mrb[69].mxu1 }
 0x248   : > { %v4927_v5 = vpop.eup %4926  ;;  %v1652_v14 = vadd.f32 %v5718_v28, %v1651_v0 }
 0x249   : > { %v4929_v12 = vpop.eup %4928  ;;  %4485 = vmatprep.mubr.msk.f32.mxu0 %vm1162_vm1, %v4927_v5 }
 0x24a   : > { %4938 = vtanh.f32 %v1652_v14  ;;  %v4395_v13 = vpop.f32.mrb[70].mxu1  ;;  %4486 = vmatmul.mubr.msk.f32.gmra.mrb[82].mxu0 %vm1162_vm1, %v4929_v12 }
 0x24b   : > { %4940 = vtanh.f32 %v1657_v4  ;;  %v1667_v30 = vadd.f32 %v4395_v13, %v5718_v28  ;;  %v1661_v16 = vpop.f32.mrb[71].mxu1 }
 0x24c   : > { %v4931_v18 = vpop.eup %4930  ;;  %v1662_v25 = vadd.f32 %v5718_v28, %v1661_v16 }
 0x24d   : > { %v4933_v19 = vpop.eup %4932  ;;  %4488 = vmatprep.mubr.msk.f32.mxu0 %vm1162_vm1, %v4931_v18 }
 0x24e   : > { %4942 = vtanh.f32 %v1662_v25  ;;  %v4398_v7 = vpop.f32.mrb[72].mxu1  ;;  %4489 = vmatmul.mubr.msk.f32.gmra.mrb[84].mxu0 %vm1162_vm1, %v4933_v19 }
 0x24f   : > { %4944 = vtanh.f32 %v1667_v30  ;;  %v1677_v20 = vadd.f32 %v4398_v7, %v5718_v28  ;;  %v1671_v33 = vpop.f32.mrb[73].mxu1 }
 0x250   : > { %v4935_v41 = vpop.eup %4934  ;;  %v1672_v1 = vadd.f32 %v5718_v28, %v1671_v33 }
 0x251   : > { %v4937_v22 = vpop.eup %4936  ;;  %4946 = vtanh.f32 %v1677_v20  ;;  %4491 = vmatprep.mubr.msk.f32.mxu0 %vm1162_vm1, %v4935_v41  ;;  %v6207_v20 = vld [vmem:[%s1809_s20] ss:$0 sm:$0xff] }
 0x252   : > { %4948 = vtanh.f32 %v1672_v1  ;;  %v4401_v36 = vpop.f32.mrb[74].mxu1  ;;  %4492 = vmatmul.mubr.msk.f32.gmra.mrb[86].mxu0 %vm1162_vm1, %v4937_v22 }
 0x253   : > { %v1687_v10 = vadd.f32 %v4401_v36, %v5718_v28  ;;  %v1681_v9 = vpop.f32.mrb[75].mxu1 }
 0x254   : > { %v4939_v42 = vpop.eup %4938  ;;  %v1682_v45 = vadd.f32 %v5718_v28, %v1681_v9 }
 0x255   : > { %v4941_v24 = vpop.eup %4940  ;;  %4950 = vtanh.f32 %v1687_v10  ;;  %4494 = vmatprep.mubr.msk.f32.mxu0 %vm1162_vm1, %v4939_v42 }
 0x256   : > { %4952 = vtanh.f32 %v1682_v45  ;;  %v4404_v46 = vpop.f32.mrb[76].mxu1  ;;  %4495 = vmatmul.mubr.msk.f32.gmra.mrb[88].mxu0 %vm1162_vm1, %v4941_v24 }
 0x257   : > { %v1697_v37 = vadd.f32 %v4404_v46, %v5718_v28  ;;  %v1691_v48 = vpop.f32.mrb[77].mxu1 }
 0x258   : > { %v4943_v50 = vpop.eup %4942  ;;  %v1692_v23 = vadd.f32 %v5718_v28, %v1691_v48  ;;  %v6219_v48 = vld [vmem:[%s2458_s26] ss:$0 sm:$0xff] }
 0x259   : > { %v4945_v15 = vpop.eup %4944  ;;  %4954 = vtanh.f32 %v1697_v37  ;;  %4497 = vmatprep.mubr.msk.f32.mxu0 %vm1162_vm1, %v4943_v50 }
 0x25a   : > { %4956 = vtanh.f32 %v1692_v23  ;;  %v4407_v29 = vpop.f32.mrb[78].mxu1  ;;  %4498 = vmatmul.mubr.msk.f32.gmra.mrb[90].mxu0 %vm1162_vm1, %v4945_v15 }
 0x25b   : > { %v4947_v53 = vpop.eup %4946  ;;  %v1707_v32 = vadd.f32 %v4407_v29, %v5718_v28  ;;  %v1701_v44 = vpop.f32.mrb[79].mxu1 }
 0x25c   : > { %v4949_v34 = vpop.eup %4948  ;;  %v1702_v56 = vadd.f32 %v5718_v28, %v1701_v44 }
 0x25d   : > { %4958 = vtanh.f32 %v1707_v32  ;;  %4500 = vmatprep.mubr.msk.f32.mxu0 %vm1162_vm1, %v4949_v34 }
 0x25e   : > { %4960 = vtanh.f32 %v1702_v56  ;;  %v4410_v39 = vpop.f32.mrb[80].mxu1  ;;  %4501 = vmatmul.mubr.msk.f32.gmra.mrb[92].mxu0 %vm1162_vm1, %v4947_v53 }
 0x25f   : > { %v4951_v27 = vpop.eup %4950  ;;  %v1717_v59 = vadd.f32 %v4410_v39, %v5718_v28  ;;  %v1711_v60 = vpop.f32.mrb[81].mxu1 }
 0x260   : > { %v4953_v40 = vpop.eup %4952  ;;  %v1712_v43 = vadd.f32 %v5718_v28, %v1711_v60 }
 0x261   : > { %4962 = vtanh.f32 %v1717_v59  ;;  %4503 = vmatprep.mubr.msk.f32.mxu0 %vm1162_vm1, %v4953_v40 }
 0x262   : > { %4964 = vtanh.f32 %v1712_v43  ;;  %v4413_v62 = vpop.f32.mrb[82].mxu1  ;;  %4504 = vmatmul.mubr.msk.f32.gmra.mrb[94].mxu0 %vm1162_vm1, %v4951_v27 }
 0x263   : > { %v4955_v47 = vpop.eup %4954  ;;  %v1727_v2 = vadd.f32 %v4413_v62, %v5718_v28  ;;  %v1721_v51 = vpop.f32.mrb[83].mxu1 }
 0x264   : > { %v4957_v55 = vpop.eup %4956  ;;  %v1722_v4 = vadd.f32 %v5718_v28, %v1721_v51 }
 0x265   : > { %4966 = vtanh.f32 %v1727_v2  ;;  %4506 = vmatprep.mubr.msk.f32.mxu0 %vm1162_vm1, %v4957_v55 }
 0x266   : > { %4968 = vtanh.f32 %v1722_v4  ;;  %v4416_v0 = vpop.f32.mrb[84].mxu1  ;;  %4507 = vmatmul.mubr.msk.f32.gmra.mrb[96].mxu0 %vm1162_vm1, %v4955_v47 }
 0x267   : > { %v4959_v5 = vpop.eup %4958  ;;  %v1737_v14 = vadd.f32 %v4416_v0, %v5718_v28  ;;  %v1731_v12 = vpop.f32.mrb[85].mxu1 }
 0x268   : > { %v4961_v13 = vpop.eup %4960  ;;  %v1732_v30 = vadd.f32 %v5718_v28, %v1731_v12 }
 0x269   : > { %4970 = vtanh.f32 %v1737_v14  ;;  %4509 = vmatprep.mubr.msk.f32.mxu0 %vm1162_vm1, %v4961_v13 }
 0x26a   : > { %4972 = vtanh.f32 %v1732_v30  ;;  %4510 = vmatmul.mubr.msk.f32.gmra.mrb[98].mxu0 %vm1162_vm1, %v4959_v5 }
 0x26b   : > { %v4963_v16 = vpop.eup %4962 }
 0x26c   : > { %v4965_v18 = vpop.eup %4964 }
 0x26d   : > { %4512 = vmatprep.mubr.msk.f32.mxu0 %vm1162_vm1, %v4965_v18 }
 0x26e   : > { %4513 = vmatmul.mubr.msk.f32.gmra.mrb[100].mxu0 %vm1162_vm1, %v4963_v16 }
 0x26f   : > { %v4967_v25 = vpop.eup %4966 }
 0x270   : > { %v4969_v19 = vpop.eup %4968 }
 0x271   : > { %4515 = vmatprep.mubr.msk.f32.mxu0 %vm1162_vm1, %v4969_v19 }
 0x272   : > { %4516 = vmatmul.mubr.msk.f32.gmra.mrb[102].mxu0 %vm1162_vm1, %v4967_v25 }
 0x273   : > { %v4971_v28 = vpop.eup %4970 }
 0x274   : > { %v4973_v7 = vpop.eup %4972 }
 0x275   : > { %4518 = vmatprep.mubr.msk.f32.mxu0 %vm1162_vm1, %v4973_v7 }
 0x276   : > { %4519 = vmatmul.mubr.msk.f32.gmra.mrb[104].mxu0 %vm1162_vm1, %v4971_v28 }
 0x2cd   : > { %v4427_v33 = vpop.f32.mrb[42].mxu0 }
 0x2ce   : > { %v2081_v41 = vadd.f32 %v4427_v33, %v6207_v20  ;;  %v2075_v1 = vpop.f32.mrb[43].mxu0 }
 0x2cf   : > { %v2076_v22 = vadd.f32 %v6207_v20, %v2075_v1 }
 0x2d0   : > { %4974 = vtanh.f32 %v2081_v41 }
 0x2d1   : > { %4976 = vtanh.f32 %v2076_v22  ;;  %v4430_v36 = vpop.f32.mrb[44].mxu0 }
 0x2d2   : > { %v2091_v10 = vadd.f32 %v4430_v36, %v6207_v20  ;;  %v2085_v9 = vpop.f32.mrb[45].mxu0 }
 0x2d3   : > { %v2086_v42 = vadd.f32 %v6207_v20, %v2085_v9 }
 0x2d4   : > { %4978 = vtanh.f32 %v2091_v10 }
 0x2d5   : > { %4980 = vtanh.f32 %v2086_v42  ;;  %v4433_v45 = vpop.f32.mrb[46].mxu0 }
 0x2d6   : > { %v2101_v24 = vadd.f32 %v4433_v45, %v6207_v20  ;;  %v2095_v46 = vpop.f32.mrb[47].mxu0 }
 0x2d7   : > { %v2096_v37 = vadd.f32 %v6207_v20, %v2095_v46 }
 0x2d8   : > { %4982 = vtanh.f32 %v2101_v24 }
 0x2d9   : > { %4984 = vtanh.f32 %v2096_v37  ;;  %v4436_v50 = vpop.f32.mrb[48].mxu0 }
 0x2da   : > { %v4975_v23 = vpop.eup %4974  ;;  %v2111_v15 = vadd.f32 %v4436_v50, %v6207_v20  ;;  %v2105_v29 = vpop.f32.mrb[49].mxu0 }
 0x2db   : > { %v4977_v53 = vpop.eup %4976  ;;  %v2106_v32 = vadd.f32 %v6207_v20, %v2105_v29  ;;  %v2467_v44 = vmul.f32 %v4975_v23, %v6219_v48 }
 0x2dc   : > { %4986 = vtanh.f32 %v2111_v15  ;;  %v2466_v39 = vmul.f32 %v4977_v53, %v6219_v48 }
 0x2dd   : > { %4988 = vtanh.f32 %v2106_v32  ;;  %v4439_v34 = vpop.f32.mrb[50].mxu0  ;;  %v2533_v56 = vsel %vm1162_vm1, %v2467_v44, 0.0 }
 0x2de   : > { %v4979_v27 = vpop.eup %4978  ;;  %v2121_v59 = vadd.f32 %v4439_v34, %v6207_v20  ;;  %2534 = vadd.xlane.f32.xlu0 %v2533_v56  ;;  %v2115_v60 = vpop.f32.mrb[51].mxu0  ;;  %v2530_v51 = vsel %vm1162_vm1, %v2466_v39, 0.0 }
 0x2df   : > { %v4981_v40 = vpop.eup %4980  ;;  %v2116_v43 = vadd.f32 %v6207_v20, %v2115_v60  ;;  %v2469_v62 = vmul.f32 %v4979_v27, %v6219_v48 }
 0x2e0   : > { %4990 = vtanh.f32 %v2121_v59  ;;  %v2468_v55 = vmul.f32 %v4981_v40, %v6219_v48 }
 0x2e1   : > { %4992 = vtanh.f32 %v2116_v43  ;;  %v4442_v47 = vpop.f32.mrb[52].mxu0  ;;  %v2539_v2 = vsel %vm1162_vm1, %v2469_v62, 0.0 }
 0x2e2   : > { %v4983_v4 = vpop.eup %4982  ;;  %v2131_v0 = vadd.f32 %v4442_v47, %v6207_v20  ;;  %2540 = vadd.xlane.f32.xlu1 %v2539_v2  ;;  %v2125_v5 = vpop.f32.mrb[53].mxu0  ;;  %2531 = vadd.xlane.f32.xlu0 %v2530_v51  ;;  %v2536_v16 = vsel %vm1162_vm1, %v2468_v55, 0.0 }
 0x2e3   : > { %v4985_v14 = vpop.eup %4984  ;;  %v2126_v12 = vadd.f32 %v6207_v20, %v2125_v5  ;;  %v2471_v18 = vmul.f32 %v4983_v4, %v6219_v48 }
 0x2e4   : > { %4994 = vtanh.f32 %v2131_v0  ;;  %v2470_v13 = vmul.f32 %v4985_v14, %v6219_v48 }
 0x2e5   : > { %4996 = vtanh.f32 %v2126_v12  ;;  %v4445_v30 = vpop.f32.mrb[54].mxu0  ;;  %v2545_v36 = vsel %vm1162_vm1, %v2471_v18, 0.0 }
 0x2e6   : > { %v4987_v25 = vpop.eup %4986  ;;  %v2141_v19 = vadd.f32 %v4445_v30, %v6207_v20  ;;  %v2135_v28 = vpop.f32.mrb[55].mxu0  ;;  %2537 = vadd.xlane.f32.xlu1 %v2536_v16  ;;  %v2542_v7 = vsel %vm1162_vm1, %v2470_v13, 0.0 }
 0x2e7   : > { %v4989_v33 = vpop.eup %4988  ;;  %v2136_v41 = vadd.f32 %v6207_v20, %v2135_v28  ;;  %2543 = vadd.xlane.f32.xlu0 %v2542_v7  ;;  %v2473_v10 = vmul.f32 %v4987_v25, %v6219_v48 }
 0x2e8   : > { %4998 = vtanh.f32 %v2141_v19  ;;  %v2472_v1 = vmul.f32 %v4989_v33, %v6219_v48 }
 0x2e9   : > { %5000 = vtanh.f32 %v2136_v41  ;;  %v4448_v22 = vpop.f32.mrb[56].mxu0  ;;  %v2551_v15 = vsel %vm1162_vm1, %v2473_v10, 0.0 }
 0x2ea   : > { %v4991_v9 = vpop.eup %4990  ;;  %v2151_v42 = vadd.f32 %v4448_v22, %v6207_v20  ;;  %v2145_v45 = vpop.f32.mrb[57].mxu0  ;;  %2546 = vadd.xlane.f32.xlu1 %v2545_v36  ;;  %v2548_v24 = vsel %vm1162_vm1, %v2472_v1, 0.0 }
 0x2eb   : > { %v4993_v46 = vpop.eup %4992  ;;  %v2146_v37 = vadd.f32 %v6207_v20, %v2145_v45  ;;  %2549 = vadd.xlane.f32.xlu0 %v2548_v24  ;;  %v2475_v29 = vmul.f32 %v4991_v9, %v6219_v48 }
 0x2ec   : > { %5002 = vtanh.f32 %v2151_v42  ;;  %v2474_v50 = vmul.f32 %v4993_v46, %v6219_v48 }
 0x2ed   : > { %5004 = vtanh.f32 %v2146_v37  ;;  %v4451_v23 = vpop.f32.mrb[58].mxu0  ;;  %v2557_v60 = vsel %vm1162_vm1, %v2475_v29, 0.0 }
 0x2ee   : > { %v4995_v53 = vpop.eup %4994  ;;  %v2161_v32 = vadd.f32 %v4451_v23, %v6207_v20  ;;  %v2155_v44 = vpop.f32.mrb[59].mxu0  ;;  %2552 = vadd.xlane.f32.xlu1 %v2551_v15  ;;  %v2554_v34 = vsel %vm1162_vm1, %v2474_v50, 0.0 }
 0x2ef   : > { %v4997_v56 = vpop.eup %4996  ;;  %v2156_v39 = vadd.f32 %v6207_v20, %v2155_v44  ;;  %2555 = vadd.xlane.f32.xlu0 %v2554_v34  ;;  %v2477_v40 = vmul.f32 %v4995_v53, %v6219_v48 }
 0x2f0   : > { %5006 = vtanh.f32 %v2161_v32  ;;  %v2476_v27 = vmul.f32 %v4997_v56, %v6219_v48 }
 0x2f1   : > { %5008 = vtanh.f32 %v2156_v39  ;;  %v4454_v59 = vpop.f32.mrb[60].mxu0  ;;  %v2563_v5 = vsel %vm1162_vm1, %v2477_v40, 0.0 }
 0x2f2   : > { %v4999_v43 = vpop.eup %4998  ;;  %v2171_v62 = vadd.f32 %v4454_v59, %v6207_v20  ;;  %v2165_v47 = vpop.f32.mrb[61].mxu0  ;;  %2558 = vadd.xlane.f32.xlu1 %v2557_v60  ;;  %v2560_v2 = vsel %vm1162_vm1, %v2476_v27, 0.0 }
 0x2f3   : > { %v5001_v51 = vpop.eup %5000  ;;  %v2166_v55 = vadd.f32 %v6207_v20, %v2165_v47  ;;  %2561 = vadd.xlane.f32.xlu0 %v2560_v2  ;;  %v2479_v14 = vmul.f32 %v4999_v43, %v6219_v48 }
 0x2f4   : > { %5010 = vtanh.f32 %v2171_v62  ;;  %v2478_v4 = vmul.f32 %v5001_v51, %v6219_v48 }
 0x2f5   : > { %5012 = vtanh.f32 %v2166_v55  ;;  %v4457_v0 = vpop.f32.mrb[62].mxu0  ;;  %v2569_v7 = vsel %vm1162_vm1, %v2479_v14, 0.0 }
 0x2f6   : > { %v5003_v12 = vpop.eup %5002  ;;  %v2181_v13 = vadd.f32 %v4457_v0, %v6207_v20  ;;  %v2175_v30 = vpop.f32.mrb[63].mxu0  ;;  %2564 = vadd.xlane.f32.xlu1 %v2563_v5  ;;  %v2566_v16 = vsel %vm1162_vm1, %v2478_v4, 0.0 }
 0x2f7   : > { %v5005_v18 = vpop.eup %5004  ;;  %v2176_v25 = vadd.f32 %v6207_v20, %v2175_v30  ;;  %2567 = vadd.xlane.f32.xlu0 %v2566_v16  ;;  %v2481_v33 = vmul.f32 %v5003_v12, %v6219_v48 }
 0x2f8   : > { %5014 = vtanh.f32 %v2181_v13  ;;  %v2480_v19 = vmul.f32 %v5005_v18, %v6219_v48 }
 0x2f9   : > { %5016 = vtanh.f32 %v2176_v25  ;;  %v4460_v28 = vpop.f32.mrb[64].mxu0  ;;  %v2575_v24 = vsel %vm1162_vm1, %v2481_v33, 0.0 }
 0x2fa   : > { %v5007_v41 = vpop.eup %5006  ;;  %v2191_v1 = vadd.f32 %v4460_v28, %v6207_v20  ;;  %v2185_v22 = vpop.f32.mrb[65].mxu0  ;;  %2570 = vadd.xlane.f32.xlu1 %v2569_v7  ;;  %v2572_v36 = vsel %vm1162_vm1, %v2480_v19, 0.0 }
 0x2fb   : > { %v5009_v10 = vpop.eup %5008  ;;  %v2186_v9 = vadd.f32 %v6207_v20, %v2185_v22  ;;  %2573 = vadd.xlane.f32.xlu0 %v2572_v36  ;;  %v2483_v46 = vmul.f32 %v5007_v41, %v6219_v48 }
 0x2fc   : > { %5018 = vtanh.f32 %v2191_v1  ;;  %v2482_v42 = vmul.f32 %v5009_v10, %v6219_v48 }
 0x2fd   : > { %5020 = vtanh.f32 %v2186_v9  ;;  %v4463_v45 = vpop.f32.mrb[66].mxu0  ;;  %v2581_v34 = vsel %vm1162_vm1, %v2483_v46, 0.0 }
 0x2fe   : > { %v5011_v37 = vpop.eup %5010  ;;  %v2201_v50 = vadd.f32 %v4463_v45, %v6207_v20  ;;  %v2195_v23 = vpop.f32.mrb[67].mxu0  ;;  %2576 = vadd.xlane.f32.xlu1 %v2575_v24  ;;  %v2578_v15 = vsel %vm1162_vm1, %v2482_v42, 0.0 }
 0x2ff   : > { %v5013_v29 = vpop.eup %5012  ;;  %v2196_v53 = vadd.f32 %v6207_v20, %v2195_v23  ;;  %2579 = vadd.xlane.f32.xlu0 %v2578_v15  ;;  %v2485_v56 = vmul.f32 %v5011_v37, %v6219_v48 }
 0x300   : > { %5022 = vtanh.f32 %v2201_v50  ;;  %v2484_v32 = vmul.f32 %v5013_v29, %v6219_v48 }
 0x301   : > { %5024 = vtanh.f32 %v2196_v53  ;;  %v4466_v44 = vpop.f32.mrb[68].mxu0  ;;  %v2587_v2 = vsel %vm1162_vm1, %v2485_v56, 0.0 }
 0x302   : > { %v5015_v39 = vpop.eup %5014  ;;  %v2211_v27 = vadd.f32 %v4466_v44, %v6207_v20  ;;  %v2205_v59 = vpop.f32.mrb[69].mxu0  ;;  %2582 = vadd.xlane.f32.xlu1 %v2581_v34  ;;  %v2584_v60 = vsel %vm1162_vm1, %v2484_v32, 0.0 }
 0x303   : > { %v5017_v40 = vpop.eup %5016  ;;  %v2206_v43 = vadd.f32 %v6207_v20, %v2205_v59  ;;  %2585 = vadd.xlane.f32.xlu0 %v2584_v60  ;;  %v2487_v51 = vmul.f32 %v5015_v39, %v6219_v48 }
 0x304   : > { %5026 = vtanh.f32 %v2211_v27  ;;  %v2486_v62 = vmul.f32 %v5017_v40, %v6219_v48 }
 0x305   : > { %5028 = vtanh.f32 %v2206_v43  ;;  %v4469_v47 = vpop.f32.mrb[70].mxu0  ;;  %v2593_v16 = vsel %vm1162_vm1, %v2487_v51, 0.0 }
 0x306   : > { %v5019_v55 = vpop.eup %5018  ;;  %v2221_v4 = vadd.f32 %v4469_v47, %v6207_v20  ;;  %v2215_v0 = vpop.f32.mrb[71].mxu0  ;;  %2588 = vadd.xlane.f32.xlu1 %v2587_v2  ;;  %v2590_v5 = vsel %vm1162_vm1, %v2486_v62, 0.0 }
 0x307   : > { %v5021_v14 = vpop.eup %5020  ;;  %v2216_v12 = vadd.f32 %v6207_v20, %v2215_v0  ;;  %2591 = vadd.xlane.f32.xlu0 %v2590_v5  ;;  %v2489_v18 = vmul.f32 %v5019_v55, %v6219_v48 }
 0x308   : > { %5030 = vtanh.f32 %v2221_v4  ;;  %v2488_v13 = vmul.f32 %v5021_v14, %v6219_v48 }
 0x309   : > { %5032 = vtanh.f32 %v2216_v12  ;;  %v4472_v30 = vpop.f32.mrb[72].mxu0  ;;  %v2599_v36 = vsel %vm1162_vm1, %v2489_v18, 0.0 }
 0x30a   : > { %v5023_v25 = vpop.eup %5022  ;;  %v2231_v19 = vadd.f32 %v4472_v30, %v6207_v20  ;;  %v2225_v28 = vpop.f32.mrb[73].mxu0  ;;  %2594 = vadd.xlane.f32.xlu1 %v2593_v16  ;;  %v2596_v7 = vsel %vm1162_vm1, %v2488_v13, 0.0 }
 0x30b   : > { %v5025_v33 = vpop.eup %5024  ;;  %v2226_v41 = vadd.f32 %v6207_v20, %v2225_v28  ;;  %2597 = vadd.xlane.f32.xlu0 %v2596_v7  ;;  %v2491_v10 = vmul.f32 %v5023_v25, %v6219_v48 }
 0x30c   : > { %5034 = vtanh.f32 %v2231_v19  ;;  %v2490_v1 = vmul.f32 %v5025_v33, %v6219_v48 }
 0x30d   : > { %5036 = vtanh.f32 %v2226_v41  ;;  %v4475_v22 = vpop.f32.mrb[74].mxu0  ;;  %v2605_v15 = vsel %vm1162_vm1, %v2491_v10, 0.0 }
 0x30e   : > { %v5027_v9 = vpop.eup %5026  ;;  %v2241_v42 = vadd.f32 %v4475_v22, %v6207_v20  ;;  %v2235_v45 = vpop.f32.mrb[75].mxu0  ;;  %2600 = vadd.xlane.f32.xlu1 %v2599_v36  ;;  %v2602_v24 = vsel %vm1162_vm1, %v2490_v1, 0.0 }
 0x30f   : > { %v5029_v46 = vpop.eup %5028  ;;  %v2236_v37 = vadd.f32 %v6207_v20, %v2235_v45  ;;  %2603 = vadd.xlane.f32.xlu0 %v2602_v24  ;;  %v2493_v29 = vmul.f32 %v5027_v9, %v6219_v48 }
 0x310   : > { %5038 = vtanh.f32 %v2241_v42  ;;  %v2492_v50 = vmul.f32 %v5029_v46, %v6219_v48 }
 0x311   : > { %5040 = vtanh.f32 %v2236_v37  ;;  %v4478_v23 = vpop.f32.mrb[76].mxu0  ;;  %v2611_v60 = vsel %vm1162_vm1, %v2493_v29, 0.0 }
 0x312   : > { %v5031_v53 = vpop.eup %5030  ;;  %v2251_v32 = vadd.f32 %v4478_v23, %v6207_v20  ;;  %v2245_v44 = vpop.f32.mrb[77].mxu0  ;;  %2606 = vadd.xlane.f32.xlu1 %v2605_v15  ;;  %v2608_v34 = vsel %vm1162_vm1, %v2492_v50, 0.0 }
 0x313   : > { %v5033_v56 = vpop.eup %5032  ;;  %v2246_v39 = vadd.f32 %v6207_v20, %v2245_v44  ;;  %2609 = vadd.xlane.f32.xlu0 %v2608_v34  ;;  %v2495_v40 = vmul.f32 %v5031_v53, %v6219_v48 }
 0x314   : > { %5042 = vtanh.f32 %v2251_v32  ;;  %v2494_v27 = vmul.f32 %v5033_v56, %v6219_v48 }
 0x315   : > { %5044 = vtanh.f32 %v2246_v39  ;;  %v4481_v59 = vpop.f32.mrb[78].mxu0  ;;  %v2617_v5 = vsel %vm1162_vm1, %v2495_v40, 0.0 }
 0x316   : > { %v5035_v43 = vpop.eup %5034  ;;  %v2261_v62 = vadd.f32 %v4481_v59, %v6207_v20  ;;  %v2255_v47 = vpop.f32.mrb[79].mxu0  ;;  %2612 = vadd.xlane.f32.xlu1 %v2611_v60  ;;  %v2614_v2 = vsel %vm1162_vm1, %v2494_v27, 0.0 }
 0x317   : > { %v5037_v51 = vpop.eup %5036  ;;  %v2256_v55 = vadd.f32 %v6207_v20, %v2255_v47  ;;  %2615 = vadd.xlane.f32.xlu0 %v2614_v2  ;;  %v2497_v14 = vmul.f32 %v5035_v43, %v6219_v48 }
 0x318   : > { %5046 = vtanh.f32 %v2261_v62  ;;  %v2496_v4 = vmul.f32 %v5037_v51, %v6219_v48 }
 0x319   : > { %5048 = vtanh.f32 %v2256_v55  ;;  %v4484_v0 = vpop.f32.mrb[80].mxu0  ;;  %v2623_v7 = vsel %vm1162_vm1, %v2497_v14, 0.0 }
 0x31a   : > { %v5039_v12 = vpop.eup %5038  ;;  %v2271_v13 = vadd.f32 %v4484_v0, %v6207_v20  ;;  %v2265_v30 = vpop.f32.mrb[81].mxu0  ;;  %2618 = vadd.xlane.f32.xlu1 %v2617_v5  ;;  %v2620_v16 = vsel %vm1162_vm1, %v2496_v4, 0.0 }
 0x31b   : > { %v5041_v18 = vpop.eup %5040  ;;  %v2266_v25 = vadd.f32 %v6207_v20, %v2265_v30  ;;  %2621 = vadd.xlane.f32.xlu0 %v2620_v16  ;;  %v2499_v33 = vmul.f32 %v5039_v12, %v6219_v48 }
 0x31c   : > { %5050 = vtanh.f32 %v2271_v13  ;;  %v2498_v19 = vmul.f32 %v5041_v18, %v6219_v48 }
 0x31d   : > { %5052 = vtanh.f32 %v2266_v25  ;;  %v4487_v28 = vpop.f32.mrb[82].mxu0  ;;  %v2629_v24 = vsel %vm1162_vm1, %v2499_v33, 0.0 }
 0x31e   : > { %v5043_v41 = vpop.eup %5042  ;;  %v2281_v1 = vadd.f32 %v4487_v28, %v6207_v20  ;;  %v2275_v22 = vpop.f32.mrb[83].mxu0  ;;  %2624 = vadd.xlane.f32.xlu1 %v2623_v7  ;;  %v2626_v36 = vsel %vm1162_vm1, %v2498_v19, 0.0 }
 0x31f   : > { %v5045_v10 = vpop.eup %5044  ;;  %v2276_v9 = vadd.f32 %v6207_v20, %v2275_v22  ;;  %2627 = vadd.xlane.f32.xlu0 %v2626_v36  ;;  %v2501_v46 = vmul.f32 %v5043_v41, %v6219_v48 }
 0x320   : > { %5054 = vtanh.f32 %v2281_v1  ;;  %v2500_v42 = vmul.f32 %v5045_v10, %v6219_v48 }
 0x321   : > { %5056 = vtanh.f32 %v2276_v9  ;;  %v4490_v45 = vpop.f32.mrb[84].mxu0  ;;  %v2635_v34 = vsel %vm1162_vm1, %v2501_v46, 0.0 }
 0x322   : > { %v5047_v37 = vpop.eup %5046  ;;  %v2291_v50 = vadd.f32 %v4490_v45, %v6207_v20  ;;  %v2285_v23 = vpop.f32.mrb[85].mxu0  ;;  %2630 = vadd.xlane.f32.xlu1 %v2629_v24  ;;  %v2632_v15 = vsel %vm1162_vm1, %v2500_v42, 0.0 }
 0x323   : > { %v5049_v29 = vpop.eup %5048  ;;  %v2286_v53 = vadd.f32 %v6207_v20, %v2285_v23  ;;  %2633 = vadd.xlane.f32.xlu0 %v2632_v15  ;;  %v2503_v56 = vmul.f32 %v5047_v37, %v6219_v48 }
 0x324   : > { %5058 = vtanh.f32 %v2291_v50  ;;  %v2502_v32 = vmul.f32 %v5049_v29, %v6219_v48 }
 0x325   : > { %5060 = vtanh.f32 %v2286_v53  ;;  %v4493_v44 = vpop.f32.mrb[86].mxu0  ;;  %v2641_v2 = vsel %vm1162_vm1, %v2503_v56, 0.0 }
 0x326   : > { %v5051_v39 = vpop.eup %5050  ;;  %v2301_v27 = vadd.f32 %v4493_v44, %v6207_v20  ;;  %v2295_v59 = vpop.f32.mrb[87].mxu0  ;;  %2636 = vadd.xlane.f32.xlu1 %v2635_v34  ;;  %v2638_v60 = vsel %vm1162_vm1, %v2502_v32, 0.0 }
 0x327   : > { %v5053_v40 = vpop.eup %5052  ;;  %v2296_v43 = vadd.f32 %v6207_v20, %v2295_v59  ;;  %2639 = vadd.xlane.f32.xlu0 %v2638_v60  ;;  %v2505_v51 = vmul.f32 %v5051_v39, %v6219_v48 }
 0x328   : > { %5062 = vtanh.f32 %v2301_v27  ;;  %v2504_v62 = vmul.f32 %v5053_v40, %v6219_v48 }
 0x329   : > { %5064 = vtanh.f32 %v2296_v43  ;;  %v4496_v47 = vpop.f32.mrb[88].mxu0  ;;  %v2647_v16 = vsel %vm1162_vm1, %v2505_v51, 0.0 }
 0x32a   : > { %v5055_v55 = vpop.eup %5054  ;;  %v2311_v4 = vadd.f32 %v4496_v47, %v6207_v20  ;;  %v2305_v0 = vpop.f32.mrb[89].mxu0  ;;  %2642 = vadd.xlane.f32.xlu1 %v2641_v2  ;;  %v2644_v5 = vsel %vm1162_vm1, %v2504_v62, 0.0 }
 0x32b   : > { %v5057_v14 = vpop.eup %5056  ;;  %v2306_v12 = vadd.f32 %v6207_v20, %v2305_v0  ;;  %2645 = vadd.xlane.f32.xlu0 %v2644_v5  ;;  %v2507_v18 = vmul.f32 %v5055_v55, %v6219_v48 }
 0x32c   : > { %5066 = vtanh.f32 %v2311_v4  ;;  %v2506_v13 = vmul.f32 %v5057_v14, %v6219_v48 }
 0x32d   : > { %5068 = vtanh.f32 %v2306_v12  ;;  %v4499_v30 = vpop.f32.mrb[90].mxu0  ;;  %v2653_v36 = vsel %vm1162_vm1, %v2507_v18, 0.0 }
 0x32e   : > { %v5059_v25 = vpop.eup %5058  ;;  %v2321_v19 = vadd.f32 %v4499_v30, %v6207_v20  ;;  %v2315_v28 = vpop.f32.mrb[91].mxu0  ;;  %2648 = vadd.xlane.f32.xlu1 %v2647_v16  ;;  %v2650_v7 = vsel %vm1162_vm1, %v2506_v13, 0.0 }
 0x32f   : > { %v5061_v33 = vpop.eup %5060  ;;  %v2316_v41 = vadd.f32 %v6207_v20, %v2315_v28  ;;  %2651 = vadd.xlane.f32.xlu0 %v2650_v7  ;;  %v2509_v10 = vmul.f32 %v5059_v25, %v6219_v48 }
 0x330   : > { %5070 = vtanh.f32 %v2321_v19  ;;  %v2508_v1 = vmul.f32 %v5061_v33, %v6219_v48 }
 0x331   : > { %5072 = vtanh.f32 %v2316_v41  ;;  %v4502_v22 = vpop.f32.mrb[92].mxu0  ;;  %v2659_v15 = vsel %vm1162_vm1, %v2509_v10, 0.0 }
 0x332   : > { %v5063_v9 = vpop.eup %5062  ;;  %v2331_v42 = vadd.f32 %v4502_v22, %v6207_v20  ;;  %v2325_v45 = vpop.f32.mrb[93].mxu0  ;;  %2654 = vadd.xlane.f32.xlu1 %v2653_v36  ;;  %v2656_v24 = vsel %vm1162_vm1, %v2508_v1, 0.0 }
 0x333   : > { %v5065_v46 = vpop.eup %5064  ;;  %v2326_v37 = vadd.f32 %v6207_v20, %v2325_v45  ;;  %2657 = vadd.xlane.f32.xlu0 %v2656_v24  ;;  %v2511_v29 = vmul.f32 %v5063_v9, %v6219_v48 }
 0x334   : > { %5074 = vtanh.f32 %v2331_v42  ;;  %v2510_v50 = vmul.f32 %v5065_v46, %v6219_v48 }
 0x335   : > { %5076 = vtanh.f32 %v2326_v37  ;;  %v4505_v23 = vpop.f32.mrb[94].mxu0  ;;  %v2665_v60 = vsel %vm1162_vm1, %v2511_v29, 0.0 }
 0x336   : > { %v5067_v53 = vpop.eup %5066  ;;  %v2341_v32 = vadd.f32 %v4505_v23, %v6207_v20  ;;  %v2335_v44 = vpop.f32.mrb[95].mxu0  ;;  %2660 = vadd.xlane.f32.xlu1 %v2659_v15  ;;  %v2662_v34 = vsel %vm1162_vm1, %v2510_v50, 0.0 }
 0x337   : > { %v5069_v56 = vpop.eup %5068  ;;  %v2336_v39 = vadd.f32 %v6207_v20, %v2335_v44  ;;  %2663 = vadd.xlane.f32.xlu0 %v2662_v34  ;;  %v2513_v40 = vmul.f32 %v5067_v53, %v6219_v48 }
 0x338   : > { %5078 = vtanh.f32 %v2341_v32  ;;  %v2512_v27 = vmul.f32 %v5069_v56, %v6219_v48 }
 0x339   : > { %5080 = vtanh.f32 %v2336_v39  ;;  %v4508_v59 = vpop.f32.mrb[96].mxu0  ;;  %v2671_v5 = vsel %vm1162_vm1, %v2513_v40, 0.0 }
 0x33a   : > { %v5071_v43 = vpop.eup %5070  ;;  %v2351_v62 = vadd.f32 %v4508_v59, %v6207_v20  ;;  %v2345_v47 = vpop.f32.mrb[97].mxu0  ;;  %2666 = vadd.xlane.f32.xlu1 %v2665_v60  ;;  %v2668_v2 = vsel %vm1162_vm1, %v2512_v27, 0.0 }
 0x33b   : > { %v5073_v51 = vpop.eup %5072  ;;  %v2346_v55 = vadd.f32 %v6207_v20, %v2345_v47  ;;  %2669 = vadd.xlane.f32.xlu0 %v2668_v2  ;;  %v2515_v14 = vmul.f32 %v5071_v43, %v6219_v48 }
 0x33c   : > { %5082 = vtanh.f32 %v2351_v62  ;;  %v2514_v4 = vmul.f32 %v5073_v51, %v6219_v48 }
 0x33d   : > { %5084 = vtanh.f32 %v2346_v55  ;;  %v4511_v0 = vpop.f32.mrb[98].mxu0  ;;  %v2677_v7 = vsel %vm1162_vm1, %v2515_v14, 0.0 }
 0x33e   : > { %v5075_v12 = vpop.eup %5074  ;;  %v2361_v13 = vadd.f32 %v4511_v0, %v6207_v20  ;;  %v2355_v30 = vpop.f32.mrb[99].mxu0  ;;  %2672 = vadd.xlane.f32.xlu1 %v2671_v5  ;;  %v2674_v16 = vsel %vm1162_vm1, %v2514_v4, 0.0 }
 0x33f   : > { %v5077_v18 = vpop.eup %5076  ;;  %v2356_v25 = vadd.f32 %v6207_v20, %v2355_v30  ;;  %2675 = vadd.xlane.f32.xlu0 %v2674_v16  ;;  %v2517_v33 = vmul.f32 %v5075_v12, %v6219_v48 }
 0x340   : > { %5086 = vtanh.f32 %v2361_v13  ;;  %v2516_v19 = vmul.f32 %v5077_v18, %v6219_v48 }
 0x341   : > { %5088 = vtanh.f32 %v2356_v25  ;;  %v4514_v28 = vpop.f32.mrb[100].mxu0  ;;  %v2683_v46 = vsel %vm1162_vm1, %v2517_v33, 0.0 }
 0x342   : > { %v5079_v41 = vpop.eup %5078  ;;  %v2371_v1 = vadd.f32 %v4514_v28, %v6207_v20  ;;  %v2365_v22 = vpop.f32.mrb[101].mxu0  ;;  %2678 = vadd.xlane.f32.xlu1 %v2677_v7  ;;  %v2680_v36 = vsel %vm1162_vm1, %v2516_v19, 0.0 }
 0x343   : > { %v5081_v10 = vpop.eup %5080  ;;  %v2366_v9 = vadd.f32 %v6207_v20, %v2365_v22  ;;  %2681 = vadd.xlane.f32.xlu0 %v2680_v36  ;;  %v2519_v42 = vmul.f32 %v5079_v41, %v6219_v48  ;;  %v6407_v36 = vpop.permute.xlu0 %3002 }
 0x344   : > { %5090 = vtanh.f32 %v2371_v1  ;;  %v2518_v45 = vmul.f32 %v5081_v10, %v6219_v48  ;;  %v6409_v10 = vpop.permute.xlu1 %2999 }
 0x345   : > { %5092 = vtanh.f32 %v2366_v9  ;;  %v4517_v24 = vpop.f32.mrb[102].mxu0  ;;  %v2689_v32 = vsel %vm1162_vm1, %v2519_v42, 0.0 }
 0x346   : > { %v5083_v37 = vpop.eup %5082  ;;  %v2381_v50 = vadd.f32 %v4517_v24, %v6207_v20  ;;  %v2375_v23 = vpop.f32.mrb[103].mxu0  ;;  %2684 = vadd.xlane.f32.xlu1 %v2683_v46  ;;  %v2686_v15 = vsel %vm1162_vm1, %v2518_v45, 0.0 }
 0x347   : > { %v5085_v29 = vpop.eup %5084  ;;  %v2376_v53 = vadd.f32 %v6207_v20, %v2375_v23  ;;  %2687 = vadd.xlane.f32.xlu0 %v2686_v15  ;;  %v2521_v44 = vmul.f32 %v5083_v37, %v6219_v48 }
 0x348   : > { %5094 = vtanh.f32 %v2381_v50  ;;  %v2520_v34 = vmul.f32 %v5085_v29, %v6219_v48 }
 0x349   : > { %5096 = vtanh.f32 %v2376_v53  ;;  %v4520_v56 = vpop.f32.mrb[104].mxu0  ;;  %v2695_v62 = vsel %vm1162_vm1, %v2521_v44, 0.0 }
 0x34a   : > { %v5087_v39 = vpop.eup %5086  ;;  %v2391_v27 = vadd.f32 %v4520_v56, %v6207_v20  ;;  %v2385_v59 = vpop.f32.mrb[105].mxu0  ;;  %2690 = vadd.xlane.f32.xlu1 %v2689_v32  ;;  %v2692_v60 = vsel %vm1162_vm1, %v2520_v34, 0.0 }
 0x34b   : > { %v5089_v40 = vpop.eup %5088  ;;  %v2386_v43 = vadd.f32 %v6207_v20, %v2385_v59  ;;  %2693 = vadd.xlane.f32.xlu0 %v2692_v60  ;;  %v2523_v47 = vmul.f32 %v5087_v39, %v6219_v48  ;;  %v6429_v39 = vld [vmem:[%s2722_s29] ss:$0 sm:$0xff] }
 0x34c   : > { %5098 = vtanh.f32 %v2391_v27  ;;  %v2522_v2 = vmul.f32 %v5089_v40, %v6219_v48 }
 0x34d   : > { %5100 = vtanh.f32 %v2386_v43  ;;  %v2701_v0 = vsel %vm1162_vm1, %v2523_v47, 0.0 }
 0x34e   : > { %v5091_v51 = vpop.eup %5090  ;;  %2696 = vadd.xlane.f32.xlu1 %v2695_v62  ;;  %v2698_v55 = vsel %vm1162_vm1, %v2522_v2, 0.0 }
 0x34f   : > { %v5093_v4 = vpop.eup %5092  ;;  %2699 = vadd.xlane.f32.xlu0 %v2698_v55  ;;  %v2525_v5 = vmul.f32 %v5091_v51, %v6219_v48 }
 0x350   : > { %v2524_v20 = vmul.f32 %v5093_v4, %v6219_v48 }
 0x351   : > { %v2707_v30 = vsel %vm1162_vm1, %v2525_v5, 0.0 }
 0x352   : > { %v5095_v14 = vpop.eup %5094  ;;  %2702 = vadd.xlane.f32.xlu1 %v2701_v0  ;;  %v2704_v12 = vsel %vm1162_vm1, %v2524_v20, 0.0 }
 0x353   : > { %v5097_v13 = vpop.eup %5096  ;;  %2705 = vadd.xlane.f32.xlu0 %v2704_v12  ;;  %v2527_v16 = vmul.f32 %v5095_v14, %v6219_v48 }
 0x354   : > { %v2526_v18 = vmul.f32 %v5097_v13, %v6219_v48 }
 0x355   : > { %v2713_v7 = vsel %vm1162_vm1, %v2527_v16, 0.0 }
 0x356   : > { %v5099_v25 = vpop.eup %5098  ;;  %2708 = vadd.xlane.f32.xlu1 %v2707_v30  ;;  %v2710_v19 = vsel %vm1162_vm1, %v2526_v18, 0.0 }
 0x357   : > { %v5101_v28 = vpop.eup %5100  ;;  %2711 = vadd.xlane.f32.xlu0 %v2710_v19  ;;  %v2529_v33 = vmul.f32 %v5099_v25, %v6219_v48 }
 0x358   : > { %v2528_v41 = vmul.f32 %v5101_v28, %v6219_v48 }
 0x359   : > { %v2719_v22 = vsel %vm1162_vm1, %v2529_v33, 0.0 }
 0x35a   : > { %2714 = vadd.xlane.f32.xlu1 %v2713_v7  ;;  %v2716_v1 = vsel %vm1162_vm1, %v2528_v41, 0.0  ;;  %vm6681_vm1 = vnez %v6676_v57  ;;  %v3512_v57 = vld [vmem:[#allocation4] sm:$0xff] }
 0x35b   : > { %2717 = vadd.xlane.f32.xlu0 %v2716_v1 }
 0x35e   : > { %2720 = vadd.xlane.f32.xlu1 %v2719_v22 }
 0x36b   : > { %v2535_v9 = vpop.xlane.xlu0 %2534 }
 0x36c   : > { %v2731_v62 = vadd.f32 %v6429_v39, %v2535_v9 }
 0x36f   : > { %v2541_v42 = vpop.xlane.xlu1 %2540  ;;  %v2532_v45 = vpop.xlane.xlu0 %2531 }
 0x370   : > { %v2730_v59 = vadd.f32 %v6429_v39, %v2532_v45  ;;  %v2733_v30 = vadd.f32 %v6429_v39, %v2541_v42 }
 0x373   : > { %v2538_v24 = vpop.xlane.xlu1 %2537 }
 0x374   : > { %v2544_v46 = vpop.xlane.xlu0 %2543  ;;  %v2732_v5 = vadd.f32 %v6429_v39, %v2538_v24 }
 0x375   : > { %v2734_v28 = vadd.f32 %v6429_v39, %v2544_v46 }
 0x377   : > { %v2547_v37 = vpop.xlane.xlu1 %2546 }
 0x378   : > { %v2550_v50 = vpop.xlane.xlu0 %2549  ;;  %v2735_v22 = vadd.f32 %v6429_v39, %v2547_v37 }
 0x37b   : > { %v2553_v48 = vpop.xlane.xlu1 %2552 }
 0x37c   : > { %v2556_v23 = vpop.xlane.xlu0 %2555 }
 0x37f   : > { %v6411_v15 = vpop.xlane.xlu1 %2558 }
 0x380   : > { %v6413_v29 = vpop.xlane.xlu0 %2561 }
 0x383   : > { %v6415_v53 = vpop.xlane.xlu1 %2564 }
 0x384   : > { %v6417_v32 = vpop.xlane.xlu0 %2567 }
 0x387   : > { %v6419_v44 = vpop.xlane.xlu1 %2570 }
 0x388   : > { %v6421_v34 = vpop.xlane.xlu0 %2573 }
 0x38b   : > { %v6427_v56 = vpop.xlane.xlu1 %2576 }
 0x38c   : > { %v2580_v27 = vpop.xlane.xlu0 %2579 }
 0x38d   : > { %v2746_v60 = vadd.f32 %v6429_v39, %v2580_v27  ;;  %v2736_v27 = vadd.f32 %v6429_v39, %v2550_v50 }
 0x38f   : > { %v4644_v40 = vpack.i.bf16 %v2730_v59, %v2746_v60  ;;  %v2583_v43 = vpop.xlane.xlu1 %2582 }
 0x390   : > { %v2747_v47 = vadd.f32 %v6429_v39, %v2583_v43  ;;  %v2586_v2 = vpop.xlane.xlu0 %2585  ;;  %v2737_v43 = vadd.f32 %v6429_v39, %v2553_v48 }
 0x391   : > { %4645 = vxpose.xlu1.b32.start [1/16] (narrow) %v4644_v40, 8  ;;  %v2748_v55 = vadd.f32 %v6429_v39, %v2586_v2 }
 0x392   : > { %v4646_v51 = vpack.i.bf16 %v2731_v62, %v2747_v47 }
 0x393   : > { %v2589_v4 = vpop.xlane.xlu1 %2588  ;;  %v4648_v20 = vpack.i.bf16 %v2732_v5, %v2748_v55  ;;  %v2739_v5 = vadd.f32 %v6429_v39, %v6411_v15 }
 0x394   : > { %v2592_v0 = vpop.xlane.xlu0 %2591  ;;  %v2749_v14 = vadd.f32 %v6429_v39, %v2589_v4 }
 0x395   : > { %4647 = vxpose.xlu1.b32.cont [2/16] (narrow) %v4646_v51, 8  ;;  %v2750_v18 = vadd.f32 %v6429_v39, %v2592_v0  ;;  %v2738_v51 = vadd.f32 %v6429_v39, %v2556_v23 }
 0x396   : > { %v4650_v16 = vpack.i.bf16 %v2733_v30, %v2749_v14 }
 0x397   : > { %v2595_v12 = vpop.xlane.xlu1 %2594  ;;  %v4652_v7 = vpack.i.bf16 %v2734_v28, %v2750_v18 }
 0x398   : > { %v2598_v13 = vpop.xlane.xlu0 %2597  ;;  %v2751_v33 = vadd.f32 %v6429_v39, %v2595_v12 }
 0x399   : > { %4649 = vxpose.xlu1.b32.cont [3/16] (narrow) %v4648_v20, 8  ;;  %v2752_v42 = vadd.f32 %v6429_v39, %v2598_v13  ;;  %v2740_v13 = vadd.f32 %v6429_v39, %v6413_v29 }
 0x39a   : > { %v4654_v9 = vpack.i.bf16 %v2735_v22, %v2751_v33  ;;  %v2742_v33 = vadd.f32 %v6429_v39, %v6417_v32  ;;  %v2744_v32 = vadd.f32 %v6429_v39, %v6421_v34 }
 0x39b   : > { %v2601_v25 = vpop.xlane.xlu1 %2600  ;;  %v4656_v59 = vpack.i.bf16 %v2736_v27, %v2752_v42 }
 0x39c   : > { %v2604_v19 = vpop.xlane.xlu0 %2603  ;;  %v2753_v46 = vadd.f32 %v6429_v39, %v2601_v25  ;;  %v2741_v25 = vadd.f32 %v6429_v39, %v6415_v53  ;;  %v2743_v53 = vadd.f32 %v6429_v39, %v6419_v44  ;;  %v2745_v44 = vadd.f32 %v6429_v39, %v6427_v56 }
 0x39d   : > { %4651 = vxpose.xlu1.b32.cont [4/16] (narrow) %v4650_v16, 8  ;;  %v2754_v37 = vadd.f32 %v6429_v39, %v2604_v19 }
 0x39e   : > { %v4658_v62 = vpack.i.bf16 %v2737_v43, %v2753_v46 }
 0x39f   : > { %v2607_v41 = vpop.xlane.xlu1 %2606  ;;  %v4660_v55 = vpack.i.bf16 %v2738_v51, %v2754_v37 }
 0x3a0   : > { %v2610_v1 = vpop.xlane.xlu0 %2609  ;;  %v2755_v50 = vadd.f32 %v6429_v39, %v2607_v41 }
 0x3a1   : > { %4653 = vxpose.xlu1.b32.cont [5/16] (narrow) %v4652_v7, 8  ;;  %v2756_v48 = vadd.f32 %v6429_v39, %v2610_v1 }
 0x3a2   : > { %v4662_v20 = vpack.i.bf16 %v2739_v5, %v2755_v50 }
 0x3a3   : > { %v2613_v45 = vpop.xlane.xlu1 %2612  ;;  %v4664_v23 = vpack.i.bf16 %v2740_v13, %v2756_v48 }
 0x3a4   : > { %v2616_v24 = vpop.xlane.xlu0 %2615  ;;  %v2757_v30 = vadd.f32 %v6429_v39, %v2613_v45 }
 0x3a5   : > { %4655 = vxpose.xlu1.b32.cont [6/16] (narrow) %v4654_v9, 8  ;;  %v2758_v19 = vadd.f32 %v6429_v39, %v2616_v24 }
 0x3a6   : > { %v4666_v15 = vpack.i.bf16 %v2741_v25, %v2757_v30 }
 0x3a7   : > { %v2619_v60 = vpop.xlane.xlu1 %2618  ;;  %v4668_v29 = vpack.i.bf16 %v2742_v33, %v2758_v19 }
 0x3a8   : > { %v2622_v40 = vpop.xlane.xlu0 %2621  ;;  %v2759_v41 = vadd.f32 %v6429_v39, %v2619_v60 }
 0x3a9   : > { %4657 = vxpose.xlu1.b32.cont [7/16] (narrow) %v4656_v59, 8  ;;  %v2760_v42 = vadd.f32 %v6429_v39, %v2622_v40 }
 0x3aa   : > { %v4670_v9 = vpack.i.bf16 %v2743_v53, %v2759_v41 }
 0x3ab   : > { %v2625_v47 = vpop.xlane.xlu1 %2624  ;;  %v4672_v27 = vpack.i.bf16 %v2744_v32, %v2760_v42 }
 0x3ac   : > { %v2628_v2 = vpop.xlane.xlu0 %2627  ;;  %v2761_v59 = vadd.f32 %v6429_v39, %v2625_v47 }
 0x3ad   : > { %4659 = vxpose.xlu1.b32.cont [8/16] (narrow) %v4658_v62, 8  ;;  %v2762_v37 = vadd.f32 %v6429_v39, %v2628_v2 }
 0x3ae   : > { %v4674_v40 = vpack.i.bf16 %v2745_v44, %v2761_v59 }
 0x3af   : > { %v2631_v4 = vpop.xlane.xlu1 %2630 }
 0x3b0   : > { %v2634_v0 = vpop.xlane.xlu0 %2633  ;;  %v2763_v47 = vadd.f32 %v6429_v39, %v2631_v4 }
 0x3b1   : > { %4661 = vxpose.xlu1.b32.cont [9/16] (narrow) %v4660_v55, 8  ;;  %v2764_v13 = vadd.f32 %v6429_v39, %v2634_v0 }
 0x3b3   : > { %v2637_v14 = vpop.xlane.xlu1 %2636 }
 0x3b4   : > { %v2640_v12 = vpop.xlane.xlu0 %2639  ;;  %v2765_v25 = vadd.f32 %v6429_v39, %v2637_v14 }
 0x3b5   : > { %4663 = vxpose.xlu1.b32.cont [10/16] (narrow) %v4662_v20, 8  ;;  %v2766_v33 = vadd.f32 %v6429_v39, %v2640_v12 }
 0x3b7   : > { %v2643_v16 = vpop.xlane.xlu1 %2642 }
 0x3b8   : > { %v2646_v18 = vpop.xlane.xlu0 %2645  ;;  %v2767_v0 = vadd.f32 %v6429_v39, %v2643_v16 }
 0x3b9   : > { %4665 = vxpose.xlu1.b32.cont [11/16] (narrow) %v4664_v23, 8  ;;  %v2768_v14 = vadd.f32 %v6429_v39, %v2646_v18 }
 0x3bb   : > { %v2649_v28 = vpop.xlane.xlu1 %2648 }
 0x3bc   : > { %v6459_v7 = vpop.xlane.xlu0 %2651  ;;  %v2769_v12 = vadd.f32 %v6429_v39, %v2649_v28 }
 0x3bd   : > { %4667 = vxpose.xlu1.b32.cont [12/16] (narrow) %v4666_v15, 8  ;;  %v2770_v16 = vadd.f32 %v6429_v39, %v6459_v7 }
 0x3bf   : > { %v6464_v1 = vpop.xlane.xlu1 %2654 }
 0x3c0   : > { %v6466_v22 = vpop.xlane.xlu0 %2657 }
 0x3c1   : > { %4669 = vxpose.xlu1.b32.cont [13/16] (narrow) %v4668_v29, 8 }
 0x3c3   : > { %v6471_v45 = vpop.xlane.xlu1 %2660 }
 0x3c4   : > { %v6473_v24 = vpop.xlane.xlu0 %2663 }
 0x3c5   : > { %4671 = vxpose.xlu1.b32.cont [14/16] (narrow) %v4670_v9, 8 }
 0x3c7   : > { %v6478_v46 = vpop.xlane.xlu1 %2666 }
 0x3c8   : > { %v6480_v60 = vpop.xlane.xlu0 %2669 }
 0x3c9   : > { %4673 = vxpose.xlu1.b32.cont [15/16] (narrow) %v4672_v27, 8 }
 0x3cb   : > { %v6484_v43 = vpop.xlane.xlu1 %2672 }
 0x3cc   : > { %v2676_v62 = vpop.xlane.xlu0 %2675 }
 0x3cd   : > { %v2778_v34 = vadd.f32 %v6429_v39, %v2676_v62  ;;  %4675 = vxpose.xlu1.b32.end [16/16] (narrow) %v4674_v40, 8 }
 0x3cf   : > { %v4681_v51 = vpack.i.bf16 %v2762_v37, %v2778_v34  ;;  %v2679_v55 = vpop.xlane.xlu1 %2678 }
 0x3d0   : > { %v2779_v50 = vadd.f32 %v6429_v39, %v2679_v55  ;;  %v2682_v5 = vpop.xlane.xlu0 %2681  ;;  %v2771_v55 = vadd.f32 %v6429_v39, %v6464_v1 }
 0x3d1   : > { %4682 = vxpose.xlu0.b32.start [1/16] (narrow) %v4681_v51, 8  ;;  %v2780_v56 = vadd.f32 %v6429_v39, %v2682_v5  ;;  %v2772_v5 = vadd.f32 %v6429_v39, %v6466_v22 }
 0x3d2   : > { %v4683_v20 = vpack.i.bf16 %v2763_v47, %v2779_v50 }
 0x3d3   : > { %v2685_v48 = vpop.xlane.xlu1 %2684  ;;  %v4685_v23 = vpack.i.bf16 %v2764_v13, %v2780_v56 }
 0x3d4   : > { %v2781_v2 = vadd.f32 %v6429_v39, %v2685_v48  ;;  %v2688_v30 = vpop.xlane.xlu0 %2687  ;;  %v2773_v48 = vadd.f32 %v6429_v39, %v6471_v45 }
 0x3d5   : > { %4684 = vxpose.xlu0.b32.cont [2/16] (narrow) %v4683_v20, 8  ;;  %v2782_v4 = vadd.f32 %v6429_v39, %v2688_v30 }
 0x3d6   : > { %v4687_v15 = vpack.i.bf16 %v2765_v25, %v2781_v2  ;;  %v2774_v2 = vadd.f32 %v6429_v39, %v6473_v24 }
 0x3d7   : > { %v2691_v19 = vpop.xlane.xlu1 %2690  ;;  %v4689_v29 = vpack.i.bf16 %v2766_v33, %v2782_v4  ;;  %v2776_v33 = vadd.f32 %v6429_v39, %v6480_v60 }
 0x3d8   : > { %v2783_v41 = vadd.f32 %v6429_v39, %v2691_v19  ;;  %v2694_v53 = vpop.xlane.xlu0 %2693 }
 0x3d9   : > { %4686 = vxpose.xlu0.b32.cont [3/16] (narrow) %v4685_v23, 8  ;;  %v2784_v42 = vadd.f32 %v6429_v39, %v2694_v53 }
 0x3da   : > { %v4691_v9 = vpack.i.bf16 %v2767_v0, %v2783_v41  ;;  %v2777_v41 = vadd.f32 %v6429_v39, %v6484_v43 }
 0x3db   : > { %v2697_v32 = vpop.xlane.xlu1 %2696  ;;  %v4693_v27 = vpack.i.bf16 %v2768_v14, %v2784_v42 }
 0x3dc   : > { %v2785_v59 = vadd.f32 %v6429_v39, %v2697_v32  ;;  %v2700_v44 = vpop.xlane.xlu0 %2699 }
 0x3dd   : > { %4688 = vxpose.xlu0.b32.cont [4/16] (narrow) %v4687_v15, 8  ;;  %v2786_v62 = vadd.f32 %v6429_v39, %v2700_v44  ;;  %v2775_v15 = vadd.f32 %v6429_v39, %v6478_v46 }
 0x3de   : > { %v4695_v40 = vpack.i.bf16 %v2769_v12, %v2785_v59 }
 0x3df   : > { %v2703_v37 = vpop.xlane.xlu1 %2702  ;;  %v4697_v34 = vpack.i.bf16 %v2770_v16, %v2786_v62 }
 0x3e0   : > { %v2787_v51 = vadd.f32 %v6429_v39, %v2703_v37  ;;  %v2706_v18 = vpop.xlane.xlu0 %2705 }
 0x3e1   : > { %4690 = vxpose.xlu0.b32.cont [5/16] (narrow) %v4689_v29, 8  ;;  %v2788_v28 = vadd.f32 %v6429_v39, %v2706_v18 }
 0x3e2   : > { %v4699_v47 = vpack.i.bf16 %v2771_v55, %v2787_v51 }
 0x3e3   : > { %v2709_v50 = vpop.xlane.xlu1 %2708  ;;  %v4701_v20 = vpack.i.bf16 %v2772_v5, %v2788_v28 }
 0x3e4   : > { %v2789_v7 = vadd.f32 %v6429_v39, %v2709_v50  ;;  %v2712_v56 = vpop.xlane.xlu0 %2711 }
 0x3e5   : > { %4692 = vxpose.xlu0.b32.cont [6/16] (narrow) %v4691_v9, 8  ;;  %v2790_v1 = vadd.f32 %v6429_v39, %v2712_v56 }
 0x3e6   : > { %v4703_v13 = vpack.i.bf16 %v2773_v48, %v2789_v7 }
 0x3e7   : > { %v2715_v23 = vpop.xlane.xlu1 %2714  ;;  %v4705_v30 = vpack.i.bf16 %v2774_v2, %v2790_v1 }
 0x3e8   : > { %v2791_v22 = vadd.f32 %v6429_v39, %v2715_v23  ;;  %v2718_v25 = vpop.xlane.xlu0 %2717 }
 0x3e9   : > { %4694 = vxpose.xlu0.b32.cont [7/16] (narrow) %v4693_v27, 8  ;;  %v2792_v45 = vadd.f32 %v6429_v39, %v2718_v25 }
 0x3ea   : > { %v4707_v4 = vpack.i.bf16 %v2775_v15, %v2791_v22 }
 0x3eb   : > { %v2721_v19 = vpop.xlane.xlu1 %2720  ;;  %v4709_v29 = vpack.i.bf16 %v2776_v33, %v2792_v45 }
 0x3ec   : > { %v2793_v24 = vadd.f32 %v6429_v39, %v2721_v19 }
 0x3ed   : > { %4696 = vxpose.xlu0.b32.cont [8/16] (narrow) %v4695_v40, 8 }
 0x3ee   : > { %v4711_v53 = vpack.i.bf16 %v2777_v41, %v2793_v24 }
 0x3f1   : > { %4698 = vxpose.xlu0.b32.cont [9/16] (narrow) %v4697_v34, 8 }
 0x3f5   : > { %4700 = vxpose.xlu0.b32.cont [10/16] (narrow) %v4699_v47, 8 }
 0x3f9   : > { %4702 = vxpose.xlu0.b32.cont [11/16] (narrow) %v4701_v20, 8 }
 0x3fd   : > { %4704 = vxpose.xlu0.b32.cont [12/16] (narrow) %v4703_v13, 8 }
 0x401   : > { %4706 = vxpose.xlu0.b32.cont [13/16] (narrow) %v4705_v30, 8 }
 0x405   : > { %4708 = vxpose.xlu0.b32.cont [14/16] (narrow) %v4707_v4, 8 }
 0x409   : > { %4710 = vxpose.xlu0.b32.cont [15/16] (narrow) %v4709_v29, 8 }
 0x40d   : > { %4712 = vxpose.xlu0.b32.end [16/16] (narrow) %v4711_v53, 8 }
 0x411   : > { %v4676_v0 = vpop.trf.xlu1 }
 0x412   : > { %v4680_v46 = vunpack.i.h.bf16 %v4676_v0  ;;  %v4677_v9 = vunpack.i.l.bf16 %v4676_v0 }
 0x414   : > { %3436 = vmatprep.mubr.f32.mxu1 %v4677_v9 }
 0x415   : > { %3437 = vmatmul.mubr.f32.vlgmr.msra.gmra.mrb[86].mxu1 %v4680_v46 }
 0x416   : > { %4576 = vmatpush3.bf16.msk.msra.mxu1 %vm5865_vm2, %v5173_v21  ;;  %vm3098_vm2 = vcmp.eq.s32.totalorder %v6409_v10, %v5727_v35 }
 0x417   : > { %4578 = vmatprep.subr.msk.bf16.mxu1 %vm5909_vm11, %v5173_v21  ;;  %vm3099_vm11 = vcmp.eq.s32.totalorder %v6407_v36, %v5727_v35 }
 0x41a   : > { %4580 = vmatpush3.bf16.msk.msra.mxu1 %vm5953_vm6, %v5173_v21  ;;  %vm4603_vm6 = vmpackc.low %vm3099_vm11, %vm3098_vm2 }
 0x41b   : > { %4582 = vmatprep.subr.msk.bf16.mxu1 %vm5997_vm3, %v5173_v21 }
 0x41e   : > { %4584 = vmatpush3.bf16.msk.msra.mxu1 %vm6037_vm10, %v5173_v21 }
 0x41f   : > { %4586 = vmatprep.subr.msk.bf16.mxu1 %vm6059_vm15, %v5173_v21 }
 0x422   : > { %4588 = vmatpush3.bf16.msk.msra.mxu1 %vm6070_vm5, %v5173_v21 }
 0x423   : > { %4590 = vmatprep.subr.msk.bf16.mxu1 %vm6080_vm9, %v5173_v21 }
 0x426   : > { %4592 = vmatpush3.bf16.msk.msra.mxu1 %vm6090_vm14, %v5173_v21 }
 0x427   : > { %4594 = vmatprep.subr.msk.bf16.mxu1 %vm6100_vm7, %v5173_v21 }
 0x42a   : > { %4596 = vmatpush3.bf16.msk.msra.mxu1 %vm6110_vm13, %v5173_v21 }
 0x42b   : > { %4598 = vmatprep.subr.msk.bf16.mxu1 %vm6681_vm1, %v5173_v21 }
 0x42e   : > { %4600 = vmatpush3.bf16.msk.msra.mxu1 %vm6130_vm4, %v5173_v21 }
 0x42f   : > { %4602 = vmatprep.subr.msk.bf16.mxu1 %vm6140_vm0, %v5173_v21 }
 0x432   : > { %4604 = vmatpush3.bf16.msk.msra.mxu1 %vm4603_vm6, %v5173_v21 }
 0x451   : > { %v4713_v6 = vpop.trf.xlu0 }
 0x452   : > { %v4717_v8 = vunpack.i.h.bf16 %v4713_v6  ;;  %v4714_v11 = vunpack.i.l.bf16 %v4713_v6 }
 0x454   : > { %3506 = vmatprep.mubr.f32.mxu1 %v4714_v11 }
 0x455   : > { %3507 = vmatmul.mubr.f32.vlgmr.msra.gmra.mrb[88].mxu1 %v4717_v8 }
 0x4e8   : > { %v4175_v38 = vpop.f32.mrb[86].mxu1 }
 0x4e9   : > { %v4176_v3 = vpop.f32.mrb[87].mxu1 }
 0x4ea   : > { %v4177_v35 = vadd.f32 %v4176_v3, %v4175_v38 }
 0x528   : > { %v4210_v31 = vpop.f32.mrb[88].mxu1 }
 0x529   : > { %v4211_v61 = vpop.f32.mrb[89].mxu1 }
 0x52a   : > { %v4212_v26 = vadd.f32 %v4211_v61, %v4210_v31 }
 0x52c   : > { %v3509_v63 = vadd.f32 %v4212_v26, %v4177_v35 }
 0x52e   : > { %v3516_v21 = vrot.slane %v3509_v63, %v3515_v58 }
 0x530   : > { %v3517_v49 = vadd.f32 %v3516_v21, %v3512_v57 }
 0x532   : > { %3518 = vst [vmem:[#allocation4] sm:$0xff] %v3517_v49 }
 0x533   : > { %5127 = shalt.err (!%p5124_p4)
}
 0x534   : > { %s5128_s0 = scalar_lea.hbm %s6622_s11, 128 }
 0x535   : > { %p5129_p5 = scmp.ne.s32.totalorder %s6622_s11, %s5128_s0  ;;  %p5134_p8 = scmp.lt.u32.totalorder %s5128_s0, %s6622_s11 }
 0x537   : > { %p5130_p6 = pnand %p5129_p5, %p6576_p11 }
 0x539   : > { %p5131_p7 = pneg %p5130_p6 }
 0x53b   : > { %p5136_p9 = pnand %p5134_p8, %p5131_p7 }
 0x53d   : > { %5139 = shalt.err (!%p5136_p9)
}
 0x53e   : > { %4608 = dma.vmem_to_hbm [thread:$0]  (%p6576_p11), %s3529_s30, 128, %s6622_s11, [#allocation5]  }
 0x53f   : > { %5155 = dma.done.wait (%p6576_p11), [#allocation5], 128  }
 0x540   : > { %5157 = vsyncadd (%p6576_p11), [#allocation5], 4294967168 }
 0x541 PF: > { %s28_s24 = sadd.s32 1, %s5168_s24   ;;  %s6683_s22 = smov %s5164_s23 }
 0x542   : > { %p25_p10 = scmp.ge.s32.totalorder %s28_s24, 4   ;;  %s6684_s23 = smov %s6686_s25 }
 0x544   :  { %27 = sbr.rel (!%p25_p10) target bundleno = 17 (0x11), region = 103 }
 0x54b   :  { %3541 = vsyncpa [#allocation5], 1 }
 0x54c   :  { %3543 = vsyncpa [#allocation5 + $0x1], 1 }

</bundles_post_ra>
